<compile_context>
chip_gen: v5e
topology: v5e:2x2
jax: 0.10.0
libtpu: 0.0.40
codegen_flags: <defaults>
</compile_context>

<pallas_src>
import functools

import jax
import jax.numpy as jnp
from jax import lax
from jax.experimental import pallas as pl
from jax.experimental.pallas import tpu as pltpu


# ----------------------------- Pallas kernel ------------------------------ #

def _conv_matmul_kernel(s_ref, x_ref, w_ref, b_ref, o_ref, *, negative_slope,
                        apply_act):
    # s_ref: (1,) f32 in SMEM (1/sigma), x_ref: (TM, K), w_ref: (K, Cout),
    # b_ref: (1, Cout), o_ref: (TM, Cout)
    acc = jnp.dot(
        x_ref[...].astype(jnp.bfloat16),
        w_ref[...].astype(jnp.bfloat16),
        preferred_element_type=jnp.float32,
    )
    acc = acc * s_ref[0] + b_ref[...]
    if apply_act:  # LeakyReLU(0.1) fused
        acc = jnp.where(acc >= 0, acc, negative_slope * acc)
    o_ref[...] = acc.astype(o_ref.dtype)


def _choose_tm(M):
    """Largest tile that divides M, is a multiple of 8 and keeps >=2 grid
    steps when possible (capped at 512).  Falls back to full-extent M."""
    if M % 8 != 0:
        return M  # full-extent block: exempt from the 8-divisibility rule
    target = min(512, max(8, M // 2))
    target -= target % 8
    for tm in range(target, 7, -8):
        if M % tm == 0:
            return tm
    return M


def pallas_matmul_bias_act(x, w_kc, b_row, inv_sigma, apply_act,
                           negative_slope=0.1):
    """x: (M, K) f32, w_kc: (K, Cout) f32, b_row: (1, Cout) f32,
    inv_sigma: (1,) f32 -> (M, Cout) f32."""
    M, K = x.shape
    K2, Cout = w_kc.shape
    assert K == K2
    TM = _choose_tm(M)
    grid = (M // TM,)

    kernel = functools.partial(
        _conv_matmul_kernel, negative_slope=negative_slope, apply_act=apply_act
    )
    flops = 2 * M * K * Cout
    bytes_accessed = 4 * (M * K + K * Cout + Cout + M * Cout)

    return pl.pallas_call(
        kernel,
        out_shape=jax.ShapeDtypeStruct((M, Cout), jnp.float32),
        grid_spec=pltpu.PrefetchScalarGridSpec(
            num_scalar_prefetch=0,
            grid=grid,
            in_specs=[
                # 1/sigma scalar lives in SMEM (folded into acc in-kernel).
                pl.BlockSpec(memory_space=pltpu.MemorySpace.SMEM),
                # Full-extent K / Cout blocks -> no host-side zero padding.
                pl.BlockSpec((TM, K), lambda i: (i, 0)),
                pl.BlockSpec((K, Cout), lambda i: (0, 0)),
                pl.BlockSpec((1, Cout), lambda i: (0, 0)),
            ],
            out_specs=pl.BlockSpec((TM, Cout), lambda i: (i, 0)),
        ),
        compiler_params=pltpu.CompilerParams(
            dimension_semantics=("parallel",)),
        cost_estimate=pl.CostEstimate(
            flops=flops, transcendentals=0, bytes_accessed=bytes_accessed),
    )(inv_sigma, x, w_kc, b_row)


# ------------------------------ Conv wrapper ------------------------------ #

def conv2d_pallas_nhwc(x_nhwc, w_kc, b_row, inv_sigma, *, ksize, stride,
                       padding, apply_act):
    """Conv2d on NHWC activations via im2col + Pallas matmul (bias/act fused).

    w_kc is the PyTorch weight reshaped to (Cin*KH*KW, Cout) with the K axis
    ordered (Cin, KH, KW) -- matching conv_general_dilated_patches' channel-
    major patch ordering.
    """
    N = x_nhwc.shape[0]
    K, Cout = w_kc.shape
    patches = lax.conv_general_dilated_patches(
        x_nhwc,
        filter_shape=(ksize, ksize),
        window_strides=(stride, stride),
        padding=((padding, padding), (padding, padding)),
        dimension_numbers=("NHWC", "HWIO", "NHWC"),
    )  # (N, Ho, Wo, Cin*KH*KW), feature dim ordered (Cin, KH, KW)
    _, Ho, Wo, Kp = patches.shape
    assert Kp == K, (Kp, K)
    pm = patches.reshape(N * Ho * Wo, K)
    out = pallas_matmul_bias_act(pm, w_kc, b_row, inv_sigma, apply_act)
    return out.reshape(N, Ho, Wo, Cout)  # already next layer's NHWC layout


# ----------------------------- Spectral norm ------------------------------ #

def spectral_sigma(w_kc, u):
    """One power iteration (PyTorch SpectralNorm default); returns sigma only.

    w_kc is the (K, Cout) transposed weight matrix; u is the (Cout,) left
    singular-vector estimate.  Only tiny matvecs -- the normalized weight is
    never materialized (1/sigma is folded into the Pallas kernel instead).
    """
    def l2n(v):
        return v / (jnp.linalg.norm(v) + 1e-12)

    v = l2n(w_kc @ u)          # (K,)    = normalize(W^T u)
    u_new = l2n(v @ w_kc)      # (Cout,) = normalize(W v)
    sigma = u_new @ (v @ w_kc)  # u^T W v
    return sigma


# ------------------------------ Discriminator ----------------------------- #

def init_conv_params(key, cout, cin, k):
    kw, kb, ku = jax.random.split(key, 3)
    fan_in = cin * k * k
    bound = 1.0 / jnp.sqrt(jnp.float32(fan_in))
    w = jax.random.uniform(kw, (cout, cin, k, k), jnp.float32, -bound, bound)
    b = jax.random.uniform(kb, (cout,), jnp.float32, -bound, bound)
    u = jax.random.normal(ku, (cout,), jnp.float32)  # spectral-norm left vec
    # One-time setup transpose: (Cout, Cin, KH, KW) -> (Cin*KH*KW, Cout).
    w_kc = w.reshape(cout, cin * k * k).T
    return w_kc, b.reshape(1, cout), u


def init_discriminator_params(key, image_size=8, in_channels=3):
    ks = jax.random.split(key, 5)
    chans = [in_channels, image_size, image_size * 2, image_size * 4,
             image_size * 8]
    params = {}
    for i in range(4):
        params[f"conv{i + 1}"] = init_conv_params(ks[i], chans[i + 1],
                                                  chans[i], 4)
    w_kc, b_row, _ = init_conv_params(ks[4], 1, chans[4], 4)  # no spectral norm
    params["last"] = (w_kc, b_row)
    return params


def discriminator_forward(params, x_nchw):
    out = jnp.transpose(x_nchw, (0, 2, 3, 1))  # single NCHW -> NHWC transpose
    for i in range(4):
        w_kc, b_row, u = params[f"conv{i + 1}"]
        inv_sigma = (1.0 / spectral_sigma(w_kc, u)).reshape(1).astype(
            jnp.float32)
        out = conv2d_pallas_nhwc(out, w_kc, b_row, inv_sigma,
                                 ksize=4, stride=2, padding=1, apply_act=True)
    w_kc, b_row = params["last"]
    out = conv2d_pallas_nhwc(out, w_kc, b_row,
                             jnp.ones((1,), jnp.float32),
                             ksize=4, stride=1, padding=0, apply_act=False)
    return jnp.transpose(out, (0, 3, 1, 2))  # (N, 1, 1, 1)


# ---------------------------------- main ----------------------------------- #

if __name__ == "__main__":
    key = jax.random.PRNGKey(0)
    kp, kx = jax.random.split(key)

    # Channel base ("image_size") = 8 -> channels 8, 16, 32, 64.  Spatial must
    # be 64 so four stride-2 convs + the final 4x4 conv yield a 1x1 output.
    params = init_discriminator_params(kp, image_size=8, in_channels=3)
    x = jax.random.normal(kx, (2, 3, 64, 64), jnp.float32)  # NCHW input

    fwd = jax.jit(discriminator_forward)
    out = jax.block_until_ready(fwd(params, x))
    assert out.shape == (2, 1, 1, 1), out.shape
    print("KERNEL_OK")
</pallas_src>

<mosaic_0001>
module attributes {stable_mosaic.version = 11 : i64} {
  func.func @_conv_matmul_kernel(%arg0: i32, %arg1: memref<1xf32, #tpu.memory_space<smem>>, %arg2: memref<512x48xf32, #tpu.memory_space<vmem>>, %arg3: memref<48x8xf32, #tpu.memory_space<vmem>>, %arg4: memref<1x8xf32, #tpu.memory_space<vmem>>, %arg5: memref<512x8xf32, #tpu.memory_space<vmem>>) attributes {dimension_semantics = [#tpu.dimension_semantics<parallel>], iteration_bounds = array<i64: 4>, scalar_prefetch = 0 : i64, scratch_operands = 0 : i64, tpu.core_type = #tpu.core_type<tc>, window_params = [{transform_indices = @transform_0, window_bounds = array<i64: 1>}, {transform_indices = @transform_1, window_bounds = array<i64: 512, 48>}, {pipeline_mode = #tpu.pipeline_mode<synchronous>, transform_indices = @transform_2, window_bounds = array<i64: 48, 8>}, {pipeline_mode = #tpu.pipeline_mode<synchronous>, transform_indices = @transform_3, window_bounds = array<i64: 1, 8>}, {transform_indices = @transform_4, window_bounds = array<i64: 512, 8>}]} {
    %c0 = arith.constant 0 : index
    %c0_0 = arith.constant 0 : index
    %0 = vector.load %arg2[%c0, %c0_0] : memref<512x48xf32, #tpu.memory_space<vmem>>, vector<512x48xf32>
    %1 = arith.truncf %0 : vector<512x48xf32> to vector<512x48xbf16>
    %c0_1 = arith.constant 0 : index
    %c0_2 = arith.constant 0 : index
    %2 = vector.load %arg3[%c0_1, %c0_2] : memref<48x8xf32, #tpu.memory_space<vmem>>, vector<48x8xf32>
    %3 = arith.truncf %2 : vector<48x8xf32> to vector<48x8xbf16>
    %cst = arith.constant dense<0.000000e+00> : vector<512x8xf32>
    %4 = tpu.matmul %1, %3, %cst {dimension_numbers = #tpu.dot_dimension_numbers<[1], [0], [0], [1], [0, 0, 1, 1], [], []>} : vector<512x48xbf16>, vector<48x8xbf16>, vector<512x8xf32> -> vector<512x8xf32>
    %c0_3 = arith.constant 0 : index
    %5 = memref.load %arg1[%c0_3] : memref<1xf32, #tpu.memory_space<smem>>
    %6 = vector.broadcast %5 : f32 to vector<512x8xf32>
    %7 = arith.mulf %4, %6 : vector<512x8xf32>
    %c0_4 = arith.constant 0 : index
    %c0_5 = arith.constant 0 : index
    %8 = vector.load %arg4[%c0_4, %c0_5] : memref<1x8xf32, #tpu.memory_space<vmem>>, vector<1x8xf32>
    %9 = vector.broadcast %8 : vector<1x8xf32> to vector<512x8xf32>
    %10 = arith.addf %7, %9 : vector<512x8xf32>
    %cst_6 = arith.constant 0.000000e+00 : f32
    %11 = vector.broadcast %cst_6 : f32 to vector<512x8xf32>
    %12 = arith.cmpf oge, %10, %11 : vector<512x8xf32>
    %cst_7 = arith.constant 1.000000e-01 : f32
    %13 = vector.broadcast %cst_7 : f32 to vector<512x8xf32>
    %14 = arith.mulf %13, %10 : vector<512x8xf32>
    %15 = arith.select %12, %10, %14 : vector<512x8xi1>, vector<512x8xf32>
    %c0_8 = arith.constant 0 : index
    %c0_9 = arith.constant 0 : index
    %16 = vector.load %arg5[%c0_8, %c0_9] : memref<512x8xf32, #tpu.memory_space<vmem>>, vector<512x8xf32>
    tpu.vector_store %arg5[%c0_8, %c0_9], %15 {strides = array<i32>} : memref<512x8xf32, #tpu.memory_space<vmem>>, vector<512x8xf32>,
    return
  }
  func.func @transform_0(%arg0: i32) -> i32 {
    %c0_i32 = arith.constant 0 : i32
    %c0_i32_0 = arith.constant 0 : i32
    return %c0_i32 : i32
  }
  func.func @transform_1(%arg0: i32) -> (i32, i32) {
    %c0_i32 = arith.constant 0 : i32
    %c0_i32_0 = arith.constant 0 : i32
    return %arg0, %c0_i32 : i32, i32
  }
  func.func @transform_2(%arg0: i32) -> (i32, i32) {
    %c0_i32 = arith.constant 0 : i32
    %c0_i32_0 = arith.constant 0 : i32
    %c0_i32_1 = arith.constant 0 : i32
    return %c0_i32, %c0_i32_0 : i32, i32
  }
  func.func @transform_3(%arg0: i32) -> (i32, i32) {
    %c0_i32 = arith.constant 0 : i32
    %c0_i32_0 = arith.constant 0 : i32
    %c0_i32_1 = arith.constant 0 : i32
    return %c0_i32, %c0_i32_0 : i32, i32
  }
  func.func @transform_4(%arg0: i32) -> (i32, i32) {
    %c0_i32 = arith.constant 0 : i32
    %c0_i32_0 = arith.constant 0 : i32
    return %arg0, %c0_i32 : i32, i32
  }
}

module attributes {stable_mosaic.version = 11 : i64} {
  func.func @_conv_matmul_kernel(%arg0: i32, %arg1: memref<1xf32, #tpu.memory_space<smem>>, %arg2: memref<256x128xf32, #tpu.memory_space<vmem>>, %arg3: memref<128x16xf32, #tpu.memory_space<vmem>>, %arg4: memref<1x16xf32, #tpu.memory_space<vmem>>, %arg5: memref<256x16xf32, #tpu.memory_space<vmem>>) attributes {dimension_semantics = [#tpu.dimension_semantics<parallel>], iteration_bounds = array<i64: 2>, scalar_prefetch = 0 : i64, scratch_operands = 0 : i64, tpu.core_type = #tpu.core_type<tc>, window_params = [{transform_indices = @transform_0, window_bounds = array<i64: 1>}, {transform_indices = @transform_1, window_bounds = array<i64: 256, 128>}, {pipeline_mode = #tpu.pipeline_mode<synchronous>, transform_indices = @transform_2, window_bounds = array<i64: 128, 16>}, {pipeline_mode = #tpu.pipeline_mode<synchronous>, transform_indices = @transform_3, window_bounds = array<i64: 1, 16>}, {transform_indices = @transform_4, window_bounds = array<i64: 256, 16>}]} {
    %c0 = arith.constant 0 : index
    %c0_0 = arith.constant 0 : index
    %0 = vector.load %arg2[%c0, %c0_0] : memref<256x128xf32, #tpu.memory_space<vmem>>, vector<256x128xf32>
    %1 = arith.truncf %0 : vector<256x128xf32> to vector<256x128xbf16>
    %c0_1 = arith.constant 0 : index
    %c0_2 = arith.constant 0 : index
    %2 = vector.load %arg3[%c0_1, %c0_2] : memref<128x16xf32, #tpu.memory_space<vmem>>, vector<128x16xf32>
    %3 = arith.truncf %2 : vector<128x16xf32> to vector<128x16xbf16>
    %cst = arith.constant dense<0.000000e+00> : vector<256x16xf32>
    %4 = tpu.matmul %1, %3, %cst {dimension_numbers = #tpu.dot_dimension_numbers<[1], [0], [0], [1], [0, 0, 1, 1], [], []>} : vector<256x128xbf16>, vector<128x16xbf16>, vector<256x16xf32> -> vector<256x16xf32>
    %c0_3 = arith.constant 0 : index
    %5 = memref.load %arg1[%c0_3] : memref<1xf32, #tpu.memory_space<smem>>
    %6 = vector.broadcast %5 : f32 to vector<256x16xf32>
    %7 = arith.mulf %4, %6 : vector<256x16xf32>
    %c0_4 = arith.constant 0 : index
    %c0_5 = arith.constant 0 : index
    %8 = vector.load %arg4[%c0_4, %c0_5] : memref<1x16xf32, #tpu.memory_space<vmem>>, vector<1x16xf32>
    %9 = vector.broadcast %8 : vector<1x16xf32> to vector<256x16xf32>
    %10 = arith.addf %7, %9 : vector<256x16xf32>
    %cst_6 = arith.constant 0.000000e+00 : f32
    %11 = vector.broadcast %cst_6 : f32 to vector<256x16xf32>
    %12 = arith.cmpf oge, %10, %11 : vector<256x16xf32>
    %cst_7 = arith.constant 1.000000e-01 : f32
    %13 = vector.broadcast %cst_7 : f32 to vector<256x16xf32>
    %14 = arith.mulf %13, %10 : vector<256x16xf32>
    %15 = arith.select %12, %10, %14 : vector<256x16xi1>, vector<256x16xf32>
    %c0_8 = arith.constant 0 : index
    %c0_9 = arith.constant 0 : index
    %16 = vector.load %arg5[%c0_8, %c0_9] : memref<256x16xf32, #tpu.memory_space<vmem>>, vector<256x16xf32>
    tpu.vector_store %arg5[%c0_8, %c0_9], %15 {strides = array<i32>} : memref<256x16xf32, #tpu.memory_space<vmem>>, vector<256x16xf32>,
    return
  }
  func.func @transform_0(%arg0: i32) -> i32 {
    %c0_i32 = arith.constant 0 : i32
    %c0_i32_0 = arith.constant 0 : i32
    return %c0_i32 : i32
  }
  func.func @transform_1(%arg0: i32) -> (i32, i32) {
    %c0_i32 = arith.constant 0 : i32
    %c0_i32_0 = arith.constant 0 : i32
    return %arg0, %c0_i32 : i32, i32
  }
  func.func @transform_2(%arg0: i32) -> (i32, i32) {
    %c0_i32 = arith.constant 0 : i32
    %c0_i32_0 = arith.constant 0 : i32
    %c0_i32_1 = arith.constant 0 : i32
    return %c0_i32, %c0_i32_0 : i32, i32
  }
  func.func @transform_3(%arg0: i32) -> (i32, i32) {
    %c0_i32 = arith.constant 0 : i32
    %c0_i32_0 = arith.constant 0 : i32
    %c0_i32_1 = arith.constant 0 : i32
    return %c0_i32, %c0_i32_0 : i32, i32
  }
  func.func @transform_4(%arg0: i32) -> (i32, i32) {
    %c0_i32 = arith.constant 0 : i32
    %c0_i32_0 = arith.constant 0 : i32
    return %arg0, %c0_i32 : i32, i32
  }
}

module attributes {stable_mosaic.version = 11 : i64} {
  func.func @_conv_matmul_kernel(%arg0: i32, %arg1: memref<1xf32, #tpu.memory_space<smem>>, %arg2: memref<64x256xf32, #tpu.memory_space<vmem>>, %arg3: memref<256x32xf32, #tpu.memory_space<vmem>>, %arg4: memref<1x32xf32, #tpu.memory_space<vmem>>, %arg5: memref<64x32xf32, #tpu.memory_space<vmem>>) attributes {dimension_semantics = [#tpu.dimension_semantics<parallel>], iteration_bounds = array<i64: 2>, scalar_prefetch = 0 : i64, scratch_operands = 0 : i64, tpu.core_type = #tpu.core_type<tc>, window_params = [{transform_indices = @transform_0, window_bounds = array<i64: 1>}, {transform_indices = @transform_1, window_bounds = array<i64: 64, 256>}, {pipeline_mode = #tpu.pipeline_mode<synchronous>, transform_indices = @transform_2, window_bounds = array<i64: 256, 32>}, {pipeline_mode = #tpu.pipeline_mode<synchronous>, transform_indices = @transform_3, window_bounds = array<i64: 1, 32>}, {transform_indices = @transform_4, window_bounds = array<i64: 64, 32>}]} {
    %c0 = arith.constant 0 : index
    %c0_0 = arith.constant 0 : index
    %0 = vector.load %arg2[%c0, %c0_0] : memref<64x256xf32, #tpu.memory_space<vmem>>, vector<64x256xf32>
    %1 = arith.truncf %0 : vector<64x256xf32> to vector<64x256xbf16>
    %c0_1 = arith.constant 0 : index
    %c0_2 = arith.constant 0 : index
    %2 = vector.load %arg3[%c0_1, %c0_2] : memref<256x32xf32, #tpu.memory_space<vmem>>, vector<256x32xf32>
    %3 = arith.truncf %2 : vector<256x32xf32> to vector<256x32xbf16>
    %cst = arith.constant dense<0.000000e+00> : vector<64x32xf32>
    %4 = tpu.matmul %1, %3, %cst {dimension_numbers = #tpu.dot_dimension_numbers<[1], [0], [0], [1], [0, 0, 1, 1], [], []>} : vector<64x256xbf16>, vector<256x32xbf16>, vector<64x32xf32> -> vector<64x32xf32>
    %c0_3 = arith.constant 0 : index
    %5 = memref.load %arg1[%c0_3] : memref<1xf32, #tpu.memory_space<smem>>
    %6 = vector.broadcast %5 : f32 to vector<64x32xf32>
    %7 = arith.mulf %4, %6 : vector<64x32xf32>
    %c0_4 = arith.constant 0 : index
    %c0_5 = arith.constant 0 : index
    %8 = vector.load %arg4[%c0_4, %c0_5] : memref<1x32xf32, #tpu.memory_space<vmem>>, vector<1x32xf32>
    %9 = vector.broadcast %8 : vector<1x32xf32> to vector<64x32xf32>
    %10 = arith.addf %7, %9 : vector<64x32xf32>
    %cst_6 = arith.constant 0.000000e+00 : f32
    %11 = vector.broadcast %cst_6 : f32 to vector<64x32xf32>
    %12 = arith.cmpf oge, %10, %11 : vector<64x32xf32>
    %cst_7 = arith.constant 1.000000e-01 : f32
    %13 = vector.broadcast %cst_7 : f32 to vector<64x32xf32>
    %14 = arith.mulf %13, %10 : vector<64x32xf32>
    %15 = arith.select %12, %10, %14 : vector<64x32xi1>, vector<64x32xf32>
    %c0_8 = arith.constant 0 : index
    %c0_9 = arith.constant 0 : index
    %16 = vector.load %arg5[%c0_8, %c0_9] : memref<64x32xf32, #tpu.memory_space<vmem>>, vector<64x32xf32>
    tpu.vector_store %arg5[%c0_8, %c0_9], %15 {strides = array<i32>} : memref<64x32xf32, #tpu.memory_space<vmem>>, vector<64x32xf32>,
    return
  }
  func.func @transform_0(%arg0: i32) -> i32 {
    %c0_i32 = arith.constant 0 : i32
    %c0_i32_0 = arith.constant 0 : i32
    return %c0_i32 : i32
  }
  func.func @transform_1(%arg0: i32) -> (i32, i32) {
    %c0_i32 = arith.constant 0 : i32
    %c0_i32_0 = arith.constant 0 : i32
    return %arg0, %c0_i32 : i32, i32
  }
  func.func @transform_2(%arg0: i32) -> (i32, i32) {
    %c0_i32 = arith.constant 0 : i32
    %c0_i32_0 = arith.constant 0 : i32
    %c0_i32_1 = arith.constant 0 : i32
    return %c0_i32, %c0_i32_0 : i32, i32
  }
  func.func @transform_3(%arg0: i32) -> (i32, i32) {
    %c0_i32 = arith.constant 0 : i32
    %c0_i32_0 = arith.constant 0 : i32
    %c0_i32_1 = arith.constant 0 : i32
    return %c0_i32, %c0_i32_0 : i32, i32
  }
  func.func @transform_4(%arg0: i32) -> (i32, i32) {
    %c0_i32 = arith.constant 0 : i32
    %c0_i32_0 = arith.constant 0 : i32
    return %arg0, %c0_i32 : i32, i32
  }
}

module attributes {stable_mosaic.version = 11 : i64} {
  func.func @_conv_matmul_kernel(%arg0: i32, %arg1: memref<1xf32, #tpu.memory_space<smem>>, %arg2: memref<16x512xf32, #tpu.memory_space<vmem>>, %arg3: memref<512x64xf32, #tpu.memory_space<vmem>>, %arg4: memref<1x64xf32, #tpu.memory_space<vmem>>, %arg5: memref<16x64xf32, #tpu.memory_space<vmem>>) attributes {dimension_semantics = [#tpu.dimension_semantics<parallel>], iteration_bounds = array<i64: 2>, scalar_prefetch = 0 : i64, scratch_operands = 0 : i64, tpu.core_type = #tpu.core_type<tc>, window_params = [{transform_indices = @transform_0, window_bounds = array<i64: 1>}, {transform_indices = @transform_1, window_bounds = array<i64: 16, 512>}, {pipeline_mode = #tpu.pipeline_mode<synchronous>, transform_indices = @transform_2, window_bounds = array<i64: 512, 64>}, {pipeline_mode = #tpu.pipeline_mode<synchronous>, transform_indices = @transform_3, window_bounds = array<i64: 1, 64>}, {transform_indices = @transform_4, window_bounds = array<i64: 16, 64>}]} {
    %c0 = arith.constant 0 : index
    %c0_0 = arith.constant 0 : index
    %0 = vector.load %arg2[%c0, %c0_0] : memref<16x512xf32, #tpu.memory_space<vmem>>, vector<16x512xf32>
    %1 = arith.truncf %0 : vector<16x512xf32> to vector<16x512xbf16>
    %c0_1 = arith.constant 0 : index
    %c0_2 = arith.constant 0 : index
    %2 = vector.load %arg3[%c0_1, %c0_2] : memref<512x64xf32, #tpu.memory_space<vmem>>, vector<512x64xf32>
    %3 = arith.truncf %2 : vector<512x64xf32> to vector<512x64xbf16>
    %cst = arith.constant dense<0.000000e+00> : vector<16x64xf32>
    %4 = tpu.matmul %1, %3, %cst {dimension_numbers = #tpu.dot_dimension_numbers<[1], [0], [0], [1], [0, 0, 1, 1], [], []>} : vector<16x512xbf16>, vector<512x64xbf16>, vector<16x64xf32> -> vector<16x64xf32>
    %c0_3 = arith.constant 0 : index
    %5 = memref.load %arg1[%c0_3] : memref<1xf32, #tpu.memory_space<smem>>
    %6 = vector.broadcast %5 : f32 to vector<16x64xf32>
    %7 = arith.mulf %4, %6 : vector<16x64xf32>
    %c0_4 = arith.constant 0 : index
    %c0_5 = arith.constant 0 : index
    %8 = vector.load %arg4[%c0_4, %c0_5] : memref<1x64xf32, #tpu.memory_space<vmem>>, vector<1x64xf32>
    %9 = vector.broadcast %8 : vector<1x64xf32> to vector<16x64xf32>
    %10 = arith.addf %7, %9 : vector<16x64xf32>
    %cst_6 = arith.constant 0.000000e+00 : f32
    %11 = vector.broadcast %cst_6 : f32 to vector<16x64xf32>
    %12 = arith.cmpf oge, %10, %11 : vector<16x64xf32>
    %cst_7 = arith.constant 1.000000e-01 : f32
    %13 = vector.broadcast %cst_7 : f32 to vector<16x64xf32>
    %14 = arith.mulf %13, %10 : vector<16x64xf32>
    %15 = arith.select %12, %10, %14 : vector<16x64xi1>, vector<16x64xf32>
    %c0_8 = arith.constant 0 : index
    %c0_9 = arith.constant 0 : index
    %16 = vector.load %arg5[%c0_8, %c0_9] : memref<16x64xf32, #tpu.memory_space<vmem>>, vector<16x64xf32>
    tpu.vector_store %arg5[%c0_8, %c0_9], %15 {strides = array<i32>} : memref<16x64xf32, #tpu.memory_space<vmem>>, vector<16x64xf32>,
    return
  }
  func.func @transform_0(%arg0: i32) -> i32 {
    %c0_i32 = arith.constant 0 : i32
    %c0_i32_0 = arith.constant 0 : i32
    return %c0_i32 : i32
  }
  func.func @transform_1(%arg0: i32) -> (i32, i32) {
    %c0_i32 = arith.constant 0 : i32
    %c0_i32_0 = arith.constant 0 : i32
    return %arg0, %c0_i32 : i32, i32
  }
  func.func @transform_2(%arg0: i32) -> (i32, i32) {
    %c0_i32 = arith.constant 0 : i32
    %c0_i32_0 = arith.constant 0 : i32
    %c0_i32_1 = arith.constant 0 : i32
    return %c0_i32, %c0_i32_0 : i32, i32
  }
  func.func @transform_3(%arg0: i32) -> (i32, i32) {
    %c0_i32 = arith.constant 0 : i32
    %c0_i32_0 = arith.constant 0 : i32
    %c0_i32_1 = arith.constant 0 : i32
    return %c0_i32, %c0_i32_0 : i32, i32
  }
  func.func @transform_4(%arg0: i32) -> (i32, i32) {
    %c0_i32 = arith.constant 0 : i32
    %c0_i32_0 = arith.constant 0 : i32
    return %arg0, %c0_i32 : i32, i32
  }
}

module attributes {stable_mosaic.version = 11 : i64} {
  func.func @_conv_matmul_kernel(%arg0: i32, %arg1: memref<1xf32, #tpu.memory_space<smem>>, %arg2: memref<2x1024xf32, #tpu.memory_space<vmem>>, %arg3: memref<1024x1xf32, #tpu.memory_space<vmem>>, %arg4: memref<1x1xf32, #tpu.memory_space<vmem>>, %arg5: memref<2x1xf32, #tpu.memory_space<vmem>>) attributes {dimension_semantics = [#tpu.dimension_semantics<parallel>], iteration_bounds = array<i64: 1>, scalar_prefetch = 0 : i64, scratch_operands = 0 : i64, tpu.core_type = #tpu.core_type<tc>, window_params = [{transform_indices = @transform_0, window_bounds = array<i64: 1>}, {transform_indices = @transform_1, window_bounds = array<i64: 2, 1024>}, {pipeline_mode = #tpu.pipeline_mode<synchronous>, transform_indices = @transform_2, window_bounds = array<i64: 1024, 1>}, {pipeline_mode = #tpu.pipeline_mode<synchronous>, transform_indices = @transform_3, window_bounds = array<i64: 1, 1>}, {transform_indices = @transform_4, window_bounds = array<i64: 2, 1>}]} {
    %c0 = arith.constant 0 : index
    %c0_0 = arith.constant 0 : index
    %0 = vector.load %arg2[%c0, %c0_0] : memref<2x1024xf32, #tpu.memory_space<vmem>>, vector<2x1024xf32>
    %1 = arith.truncf %0 : vector<2x1024xf32> to vector<2x1024xbf16>
    %c0_1 = arith.constant 0 : index
    %c0_2 = arith.constant 0 : index
    %2 = vector.load %arg3[%c0_1, %c0_2] : memref<1024x1xf32, #tpu.memory_space<vmem>>, vector<1024x1xf32>
    %3 = arith.truncf %2 : vector<1024x1xf32> to vector<1024x1xbf16>
    %cst = arith.constant dense<0.000000e+00> : vector<2x1xf32>
    %4 = tpu.matmul %1, %3, %cst {dimension_numbers = #tpu.dot_dimension_numbers<[1], [0], [0], [1], [0, 0, 1, 1], [], []>} : vector<2x1024xbf16>, vector<1024x1xbf16>, vector<2x1xf32> -> vector<2x1xf32>
    %c0_3 = arith.constant 0 : index
    %5 = memref.load %arg1[%c0_3] : memref<1xf32, #tpu.memory_space<smem>>
    %6 = vector.broadcast %5 : f32 to vector<2x1xf32>
    %7 = arith.mulf %4, %6 : vector<2x1xf32>
    %c0_4 = arith.constant 0 : index
    %c0_5 = arith.constant 0 : index
    %8 = vector.load %arg4[%c0_4, %c0_5] : memref<1x1xf32, #tpu.memory_space<vmem>>, vector<1x1xf32>
    %9 = vector.broadcast %8 : vector<1x1xf32> to vector<2x1xf32>
    %10 = arith.addf %7, %9 : vector<2x1xf32>
    %c0_6 = arith.constant 0 : index
    %c0_7 = arith.constant 0 : index
    %11 = vector.load %arg5[%c0_6, %c0_7] : memref<2x1xf32, #tpu.memory_space<vmem>>, vector<2x1xf32>
    tpu.vector_store %arg5[%c0_6, %c0_7], %10 {strides = array<i32>} : memref<2x1xf32, #tpu.memory_space<vmem>>, vector<2x1xf32>,
    return
  }
  func.func @transform_0(%arg0: i32) -> i32 {
    %c0_i32 = arith.constant 0 : i32
    %c0_i32_0 = arith.constant 0 : i32
    return %c0_i32 : i32
  }
  func.func @transform_1(%arg0: i32) -> (i32, i32) {
    %c0_i32 = arith.constant 0 : i32
    %c0_i32_0 = arith.constant 0 : i32
    return %arg0, %c0_i32 : i32, i32
  }
  func.func @transform_2(%arg0: i32) -> (i32, i32) {
    %c0_i32 = arith.constant 0 : i32
    %c0_i32_0 = arith.constant 0 : i32
    %c0_i32_1 = arith.constant 0 : i32
    return %c0_i32, %c0_i32_0 : i32, i32
  }
  func.func @transform_3(%arg0: i32) -> (i32, i32) {
    %c0_i32 = arith.constant 0 : i32
    %c0_i32_0 = arith.constant 0 : i32
    %c0_i32_1 = arith.constant 0 : i32
    return %c0_i32, %c0_i32_0 : i32, i32
  }
  func.func @transform_4(%arg0: i32) -> (i32, i32) {
    %c0_i32 = arith.constant 0 : i32
    %c0_i32_0 = arith.constant 0 : i32
    return %arg0, %c0_i32 : i32, i32
  }
}

</mosaic_0001>

<bundles_post_ra>
// kernel: discriminator_forward.5
= control target key start
LH: loop header
LB: loop body
LE: loop exit
PB: predicated region body
PF: predicated region fallthrough
CT: control target
= control target key end

     0   :  { %s1118_s17 = smov 0   ;;  %s1523_s0 = inlined_call_operand.<no memory space> [shape: f32[1], index: 0, kind: input, shape index: {}]   ;;  %s1524_s1 = inlined_call_operand.vmem [shape: f32[2048,48], index: 1, kind: input, shape index: {}]   ;;  %s1525_s2 = inlined_call_operand.vmem [shape: f32[48,8], index: 2, kind: input, shape index: {}]   ;;  %s1526_s3 = inlined_call_operand.vmem [shape: f32[1,8], index: 3, kind: input, shape index: {}]   ;;  %s1527_s4 = inlined_call_operand.vmem [shape: f32[2048,8], index: 4, kind: output, shape index: {}]  }
   0x1   :  { %9 = sst [smem:[#allocation2]] %s1523_s0 }
   0x2 LB: > { %s1021_s18 = sadd.s32 4294967295, %s1088_s17   ;;  %p1025_p0 = scmp.ge.s32.totalorder %s1088_s17, 1  ;;  %s1088_s17 = sphi %s1118_s17, %s15_s17  }
   0x3   : > { %p164_p1 = scmp.lt.s32.totalorder %s1088_s17, 5 }
   0x5   : > { %p165_p2 = pnand %p1025_p0, %p164_p1 }
   0x6   : > { %s1026_s24 = sshll.u32 (!%p165_p2), %s1021_s18, 6  ;;  %s574_s9 = sld [smem:[#allocation2]] (!%p165_p2) }
   0x7   : > { %168 = sbr.rel (%p165_p2) target bundleno = 288 (0x120), region = 36  ;;  %p191_p3 = scmp.lt.s32.totalorder (!%p165_p2), %s1026_s24, 255 }
   0xc   : > { %v303_v0 = vld [vmem:[%s1525_s2 + $0x20] sm:$0xff]  ;;  %v304_v1 = vld [vmem:[%s1525_s2 + $0x28] sm:$0xff]  ;;  %v301_v2 = vld [vmem:[%s1525_s2 + $0x10] sm:$0xff]  ;;  %s1529_s24 = smov (!%p191_p3, %s1026_s24), 255  ;;  %vm308_vm0 = vcmask 392192   ;;  %vm900_vm1 = vcmask 64512  }
   0xd   : > { %v307_v3 = vpack.c.bf16 %v304_v1, %v303_v0  ;;  %v302_v4 = vld [vmem:[%s1525_s2 + $0x18] sm:$0xff]  ;;  %v299_v6 = vld [vmem:[%s1525_s2] sm:$0xff]  ;;  %v300_v7 = vld [vmem:[%s1525_s2 + $0x8] sm:$0xff]  ;;  %s1027_s5 = sshll.u32 %s1529_s24, 3 }
   0xe   : > { %v306_v5 = vpack.c.bf16 %v302_v4, %v301_v2  ;;  %s1152_s8 = scalar_lea.vmem %s1524_s1, %s1027_s5  ;;  %v305_v8 = vpack.c.bf16 %v300_v7, %v299_v6  ;;  %s1266_s14 = scalar_lea.vmem %s1527_s4, %s1027_s5 }
   0xf   : > { %410 = vmatpush.bf16.msra.mxu0 %v307_v3  ;;  %1064 = vmatpush.bf16.msra.mxu1 %v307_v3  ;;  %v203_v9 = vld [vmem:[%s1152_s8] sm:$0xff]  ;;  %v204_v10 = vld [vmem:[%s1152_s8 + $0x8] sm:$0xff]  ;;  %v205_v21 = vld [vmem:[%s1152_s8 + $0x10] sm:$0xff] }
  0x10   : > { %1065 = vmatpush.bf16.msra.mxu2 %v307_v3  ;;  %1066 = vmatpush.bf16.msra.mxu3 %v307_v3  ;;  %v219_v11 = vld [vmem:[%s1152_s8 + $0x80] sm:$0xff]  ;;  %v220_v12 = vld [vmem:[%s1152_s8 + $0x88] sm:$0xff]  ;;  %v267_v17 = vpack.c.bf16 %v204_v10, %v203_v9  ;;  %v206_v22 = vld [vmem:[%s1152_s8 + $0x18] sm:$0xff] }
  0x11   : > { %v235_v13 = vld [vmem:[%s1152_s8 + $0x100] sm:$0xff]  ;;  %v236_v14 = vld [vmem:[%s1152_s8 + $0x108] sm:$0xff]  ;;  %v275_v18 = vpack.c.bf16 %v220_v12, %v219_v11  ;;  %v221_v23 = vld [vmem:[%s1152_s8 + $0x90] sm:$0xff]  ;;  %v268_v29 = vpack.c.bf16 %v206_v22, %v205_v21 }
  0x12   : > { %v251_v15 = vld [vmem:[%s1152_s8 + $0x180] sm:$0xff]  ;;  %v252_v16 = vld [vmem:[%s1152_s8 + $0x188] sm:$0xff]  ;;  %v283_v19 = vpack.c.bf16 %v236_v14, %v235_v13  ;;  %v222_v24 = vld [vmem:[%s1152_s8 + $0x98] sm:$0xff] }
  0x13   : > { %411 = vmatpush.bf16.msra.mxu0 %v306_v5  ;;  %1067 = vmatpush.bf16.msra.mxu1 %v306_v5  ;;  %v291_v20 = vpack.c.bf16 %v252_v16, %v251_v15  ;;  %v237_v25 = vld [vmem:[%s1152_s8 + $0x110] sm:$0xff]  ;;  %v238_v26 = vld [vmem:[%s1152_s8 + $0x118] sm:$0xff]  ;;  %v276_v30 = vpack.c.bf16 %v222_v24, %v221_v23  ;;  %v207_v33 = vld [vmem:[%s1152_s8 + $0x20] sm:$0xff] }
  0x14   : > { %1068 = vmatpush.bf16.msra.mxu2 %v306_v5  ;;  %1069 = vmatpush.bf16.msra.mxu3 %v306_v5  ;;  %v253_v27 = vld [vmem:[%s1152_s8 + $0x190] sm:$0xff]  ;;  %v254_v28 = vld [vmem:[%s1152_s8 + $0x198] sm:$0xff]  ;;  %v284_v31 = vpack.c.bf16 %v238_v26, %v237_v25  ;;  %v208_v34 = vld [vmem:[%s1152_s8 + $0x28] sm:$0xff] }
  0x15   : > { %v292_v32 = vpack.c.bf16 %v254_v28, %v253_v27  ;;  %v223_v35 = vld [vmem:[%s1152_s8 + $0xa0] sm:$0xff]  ;;  %v224_v36 = vld [vmem:[%s1152_s8 + $0xa8] sm:$0xff]  ;;  %v269_v41 = vpack.c.bf16 %v208_v34, %v207_v33  ;;  %v209_v45 = vld [vmem:[%s1152_s8 + $0x30] sm:$0xff] }
  0x16   : > { %v239_v37 = vld [vmem:[%s1152_s8 + $0x120] sm:$0xff]  ;;  %v240_v38 = vld [vmem:[%s1152_s8 + $0x128] sm:$0xff]  ;;  %v277_v42 = vpack.c.bf16 %v224_v36, %v223_v35  ;;  %v210_v46 = vld [vmem:[%s1152_s8 + $0x38] sm:$0xff] }
  0x17   : > { %412 = vmatpush.bf16.msra.mxu0 %v305_v8  ;;  %1070 = vmatpush.bf16.msra.mxu1 %v305_v8  ;;  %v255_v39 = vld [vmem:[%s1152_s8 + $0x1a0] sm:$0xff]  ;;  %v256_v40 = vld [vmem:[%s1152_s8 + $0x1a8] sm:$0xff]  ;;  %v285_v43 = vpack.c.bf16 %v240_v38, %v239_v37  ;;  %v225_v47 = vld [vmem:[%s1152_s8 + $0xb0] sm:$0xff]  ;;  %v270_v53 = vpack.c.bf16 %v210_v46, %v209_v45 }
  0x18   : > { %1071 = vmatpush.bf16.msra.mxu2 %v305_v8  ;;  %1072 = vmatpush.bf16.msra.mxu3 %v305_v8  ;;  %v293_v44 = vpack.c.bf16 %v256_v40, %v255_v39  ;;  %v226_v48 = vld [vmem:[%s1152_s8 + $0xb8] sm:$0xff]  ;;  %v241_v49 = vld [vmem:[%s1152_s8 + $0x130] sm:$0xff]  ;;  %v211_v57 = vld [vmem:[%s1152_s8 + $0x40] sm:$0xff] }
  0x19   : > { %v242_v50 = vld [vmem:[%s1152_s8 + $0x138] sm:$0xff]  ;;  %v257_v51 = vld [vmem:[%s1152_s8 + $0x1b0] sm:$0xff]  ;;  %v278_v54 = vpack.c.bf16 %v226_v48, %v225_v47  ;;  %v212_v58 = vld [vmem:[%s1152_s8 + $0x48] sm:$0xff] }
  0x1a   : > { %1030 = vmatmul.msk.bf16.vlgmr.msra.gmra.mxu0 %vm308_vm0, %v267_v17  ;;  %1038 = vmatmul.msk.bf16.vlgmr.msra.gmra.mxu1 %vm308_vm0, %v275_v18  ;;  %v258_v52 = vld [vmem:[%s1152_s8 + $0x1b8] sm:$0xff]  ;;  %v286_v55 = vpack.c.bf16 %v242_v50, %v241_v49  ;;  %v227_v59 = vld [vmem:[%s1152_s8 + $0xc0] sm:$0xff]  ;;  %v228_v60 = vld [vmem:[%s1152_s8 + $0xc8] sm:$0xff]  ;;  %v271_v1 = vpack.c.bf16 %v212_v58, %v211_v57 }
  0x1b   : > { %1046 = vmatmul.msk.bf16.vlgmr.msra.gmra.mxu2 %vm308_vm0, %v283_v19  ;;  %1054 = vmatmul.msk.bf16.vlgmr.msra.gmra.mxu3 %vm308_vm0, %v291_v20  ;;  %v294_v56 = vpack.c.bf16 %v258_v52, %v257_v51  ;;  %v243_v61 = vld [vmem:[%s1152_s8 + $0x140] sm:$0xff]  ;;  %v244_v62 = vld [vmem:[%s1152_s8 + $0x148] sm:$0xff]  ;;  %v279_v2 = vpack.c.bf16 %v228_v60, %v227_v59  ;;  %v213_v5 = vld [vmem:[%s1152_s8 + $0x50] sm:$0xff] }
  0x1c   : > { %v259_v63 = vld [vmem:[%s1152_s8 + $0x1c0] sm:$0xff]  ;;  %v260_v0 = vld [vmem:[%s1152_s8 + $0x1c8] sm:$0xff]  ;;  %v287_v3 = vpack.c.bf16 %v244_v62, %v243_v61  ;;  %v214_v6 = vld [vmem:[%s1152_s8 + $0x58] sm:$0xff] }
  0x1d   : > { %v295_v4 = vpack.c.bf16 %v260_v0, %v259_v63  ;;  %v229_v7 = vld [vmem:[%s1152_s8 + $0xd0] sm:$0xff]  ;;  %v230_v8 = vld [vmem:[%s1152_s8 + $0xd8] sm:$0xff]  ;;  %v272_v13 = vpack.c.bf16 %v214_v6, %v213_v5  ;;  %v215_v17 = vld [vmem:[%s1152_s8 + $0x60] sm:$0xff] }
  0x1e   : > { %v245_v9 = vld [vmem:[%s1152_s8 + $0x150] sm:$0xff]  ;;  %v246_v10 = vld [vmem:[%s1152_s8 + $0x158] sm:$0xff]  ;;  %v280_v14 = vpack.c.bf16 %v230_v8, %v229_v7  ;;  %v216_v18 = vld [vmem:[%s1152_s8 + $0x68] sm:$0xff] }
  0x1f   : > { %v261_v11 = vld [vmem:[%s1152_s8 + $0x1d0] sm:$0xff]  ;;  %v262_v12 = vld [vmem:[%s1152_s8 + $0x1d8] sm:$0xff]  ;;  %v288_v15 = vpack.c.bf16 %v246_v10, %v245_v9  ;;  %v231_v19 = vld [vmem:[%s1152_s8 + $0xe0] sm:$0xff]  ;;  %v273_v25 = vpack.c.bf16 %v216_v18, %v215_v17 }
  0x20   : > { %v296_v16 = vpack.c.bf16 %v262_v12, %v261_v11  ;;  %v232_v20 = vld [vmem:[%s1152_s8 + $0xe8] sm:$0xff]  ;;  %v247_v21 = vld [vmem:[%s1152_s8 + $0x160] sm:$0xff]  ;;  %v249_v33 = vld [vmem:[%s1152_s8 + $0x170] sm:$0xff] }
  0x21   : > { %v248_v22 = vld [vmem:[%s1152_s8 + $0x168] sm:$0xff]  ;;  %v263_v23 = vld [vmem:[%s1152_s8 + $0x1e0] sm:$0xff]  ;;  %v281_v26 = vpack.c.bf16 %v232_v20, %v231_v19  ;;  %v250_v34 = vld [vmem:[%s1152_s8 + $0x178] sm:$0xff] }
  0x22   : > { %v264_v24 = vld [vmem:[%s1152_s8 + $0x1e8] sm:$0xff]  ;;  %v289_v27 = vpack.c.bf16 %v248_v22, %v247_v21  ;;  %v265_v35 = vld [vmem:[%s1152_s8 + $0x1f0] sm:$0xff]  ;;  %v266_v36 = vld [vmem:[%s1152_s8 + $0x1f8] sm:$0xff]  ;;  %v290_v39 = vpack.c.bf16 %v250_v34, %v249_v33 }
  0x23   : > { %v297_v28 = vpack.c.bf16 %v264_v24, %v263_v23  ;;  %v298_v40 = vpack.c.bf16 %v266_v36, %v265_v35 }
  0x2a   : > { %1031 = vmatmul.msk.bf16.gmra.mxu0 %vm308_vm0, %v268_v29  ;;  %1039 = vmatmul.msk.bf16.gmra.mxu1 %vm308_vm0, %v276_v30  ;;  %v217_v29 = vld [vmem:[%s1152_s8 + $0x70] sm:$0xff]  ;;  %v218_v30 = vld [vmem:[%s1152_s8 + $0x78] sm:$0xff] }
  0x2b   : > { %1047 = vmatmul.msk.bf16.gmra.mxu2 %vm308_vm0, %v284_v31  ;;  %1055 = vmatmul.msk.bf16.gmra.mxu3 %vm308_vm0, %v292_v32  ;;  %v233_v31 = vld [vmem:[%s1152_s8 + $0xf0] sm:$0xff]  ;;  %v234_v32 = vld [vmem:[%s1152_s8 + $0xf8] sm:$0xff]  ;;  %v274_v37 = vpack.c.bf16 %v218_v30, %v217_v29 }
  0x2c   : > { %v282_v38 = vpack.c.bf16 %v234_v32, %v233_v31 }
  0x3a   : > { %1032 = vmatmul.msk.bf16.gmra.mxu0 %vm308_vm0, %v269_v41  ;;  %1040 = vmatmul.msk.bf16.gmra.mxu1 %vm308_vm0, %v277_v42  ;;  %v1250_v41 = vstv %s574_s9  ;;  %v1255_v42 = vld [vmem:[%s1526_s3] ss:$0 sm:$0xff] }
  0x3b   : > { %1048 = vmatmul.msk.bf16.gmra.mxu2 %vm308_vm0, %v285_v43  ;;  %1056 = vmatmul.msk.bf16.gmra.mxu3 %vm308_vm0, %v293_v44 }
  0x4a   : > { %1033 = vmatmul.msk.bf16.gmra.mxu0 %vm308_vm0, %v270_v53  ;;  %1041 = vmatmul.msk.bf16.gmra.mxu1 %vm308_vm0, %v278_v54 }
  0x4b   : > { %1049 = vmatmul.msk.bf16.gmra.mxu2 %vm308_vm0, %v286_v55  ;;  %1057 = vmatmul.msk.bf16.gmra.mxu3 %vm308_vm0, %v294_v56 }
  0x5a   : > { %1034 = vmatmul.msk.bf16.gmra.mxu0 %vm308_vm0, %v271_v1  ;;  %1042 = vmatmul.msk.bf16.gmra.mxu1 %vm308_vm0, %v279_v2 }
  0x5b   : > { %1050 = vmatmul.msk.bf16.gmra.mxu2 %vm308_vm0, %v287_v3  ;;  %1058 = vmatmul.msk.bf16.gmra.mxu3 %vm308_vm0, %v295_v4 }
  0x6a   : > { %1035 = vmatmul.msk.bf16.gmra.mxu0 %vm308_vm0, %v272_v13  ;;  %1043 = vmatmul.msk.bf16.gmra.mxu1 %vm308_vm0, %v280_v14 }
  0x6b   : > { %1051 = vmatmul.msk.bf16.gmra.mxu2 %vm308_vm0, %v288_v15  ;;  %1059 = vmatmul.msk.bf16.gmra.mxu3 %vm308_vm0, %v296_v16 }
  0x7a   : > { %1036 = vmatmul.msk.bf16.gmra.mxu0 %vm308_vm0, %v273_v25  ;;  %1044 = vmatmul.msk.bf16.gmra.mxu1 %vm308_vm0, %v281_v26 }
  0x7b   : > { %1052 = vmatmul.msk.bf16.gmra.mxu2 %vm308_vm0, %v289_v27  ;;  %1060 = vmatmul.msk.bf16.gmra.mxu3 %vm308_vm0, %v297_v28 }
  0x8a   : > { %1037 = vmatmul.msk.bf16.gmra.mxu0 %vm308_vm0, %v274_v37  ;;  %1045 = vmatmul.msk.bf16.gmra.mxu1 %vm308_vm0, %v282_v38 }
  0x8b   : > { %1053 = vmatmul.msk.bf16.gmra.mxu2 %vm308_vm0, %v290_v39  ;;  %1061 = vmatmul.msk.bf16.gmra.mxu3 %vm308_vm0, %v298_v40 }
  0x97   : > { %v414_v43 = vpop.f32.mrf.mxu0  ;;  %v454_v44 = vpop.f32.mrf.mxu1 }
  0x98   : > { %v576_v45 = vmul.f32 %v1250_v41, %v414_v43  ;;  %v592_v46 = vmul.f32 %v1250_v41, %v454_v44 }
  0x9a   : > { %v644_v47 = vadd.f32 %v1255_v42, %v576_v45  ;;  %v660_v48 = vadd.f32 %v1255_v42, %v592_v46 }
  0x9c   : > { %vm708_vm2 = vcmp.ge.f32.partialorder %v644_v47, 0.0  ;;  %v772_v49 = vmul.f32 0.1, %v644_v47  ;;  %vm724_vm3 = vcmp.ge.f32.partialorder %v660_v48, 0.0  ;;  %v788_v50 = vmul.f32 0.1, %v660_v48 }
  0x9e   : > { %v836_v51 = vsel %vm708_vm2, %v644_v47, %v772_v49  ;;  %v852_v52 = vsel %vm724_vm3, %v660_v48, %v788_v50  ;;  %v494_v53 = vpop.f32.mrf.mxu2  ;;  %v534_v54 = vpop.f32.mrf.mxu3 }
  0x9f   : > { %901 = vst.msk [vmem:[%s1266_s14] sm:$0xff] %vm900_vm1, %v836_v51  ;;  %v608_v55 = vmul.f32 %v1250_v41, %v494_v53  ;;  %v624_v56 = vmul.f32 %v1250_v41, %v534_v54  ;;  %v416_v57 = vpop.f32.mrf.mxu0  ;;  %v456_v58 = vpop.f32.mrf.mxu1 }
  0xa0   : > { %917 = vst.msk [vmem:[%s1266_s14 + $0x80] sm:$0xff] %vm900_vm1, %v852_v52  ;;  %v577_v59 = vmul.f32 %v1250_v41, %v416_v57  ;;  %v593_v60 = vmul.f32 %v1250_v41, %v456_v58 }
  0xa1   : > { %v676_v61 = vadd.f32 %v1255_v42, %v608_v55  ;;  %v692_v62 = vadd.f32 %v1255_v42, %v624_v56 }
  0xa2   : > { %v645_v63 = vadd.f32 %v1255_v42, %v577_v59  ;;  %v661_v0 = vadd.f32 %v1255_v42, %v593_v60 }
  0xa3   : > { %vm740_vm4 = vcmp.ge.f32.partialorder %v676_v61, 0.0  ;;  %v804_v1 = vmul.f32 0.1, %v676_v61  ;;  %vm756_vm5 = vcmp.ge.f32.partialorder %v692_v62, 0.0  ;;  %v820_v2 = vmul.f32 0.1, %v692_v62 }
  0xa4   : > { %vm709_vm6 = vcmp.ge.f32.partialorder %v645_v63, 0.0  ;;  %v773_v3 = vmul.f32 0.1, %v645_v63  ;;  %vm725_vm7 = vcmp.ge.f32.partialorder %v661_v0, 0.0  ;;  %v789_v4 = vmul.f32 0.1, %v661_v0 }
  0xa5   : > { %v868_v5 = vsel %vm740_vm4, %v676_v61, %v804_v1  ;;  %v884_v6 = vsel %vm756_vm5, %v692_v62, %v820_v2 }
  0xa6   : > { %933 = vst.msk [vmem:[%s1266_s14 + $0x100] sm:$0xff] %vm900_vm1, %v868_v5  ;;  %v837_v7 = vsel %vm709_vm6, %v645_v63, %v773_v3  ;;  %v853_v8 = vsel %vm725_vm7, %v661_v0, %v789_v4  ;;  %v496_v9 = vpop.f32.mrf.mxu2  ;;  %v536_v10 = vpop.f32.mrf.mxu3 }
  0xa7   : > { %949 = vst.msk [vmem:[%s1266_s14 + $0x180] sm:$0xff] %vm900_vm1, %v884_v6  ;;  %v609_v11 = vmul.f32 %v1250_v41, %v496_v9  ;;  %v625_v12 = vmul.f32 %v1250_v41, %v536_v10  ;;  %v419_v13 = vpop.f32.mrf.mxu0  ;;  %v459_v14 = vpop.f32.mrf.mxu1 }
  0xa8   : > { %902 = vst.msk [vmem:[%s1266_s14 + $0x8] sm:$0xff] %vm900_vm1, %v837_v7  ;;  %v578_v15 = vmul.f32 %v1250_v41, %v419_v13  ;;  %v594_v16 = vmul.f32 %v1250_v41, %v459_v14 }
  0xa9   : > { %918 = vst.msk [vmem:[%s1266_s14 + $0x88] sm:$0xff] %vm900_vm1, %v853_v8  ;;  %v677_v17 = vadd.f32 %v1255_v42, %v609_v11  ;;  %v693_v18 = vadd.f32 %v1255_v42, %v625_v12 }
  0xaa   : > { %v646_v19 = vadd.f32 %v1255_v42, %v578_v15  ;;  %v662_v20 = vadd.f32 %v1255_v42, %v594_v16 }
  0xab   : > { %vm741_vm8 = vcmp.ge.f32.partialorder %v677_v17, 0.0  ;;  %v805_v21 = vmul.f32 0.1, %v677_v17  ;;  %vm757_vm9 = vcmp.ge.f32.partialorder %v693_v18, 0.0  ;;  %v821_v22 = vmul.f32 0.1, %v693_v18 }
  0xac   : > { %vm710_vm10 = vcmp.ge.f32.partialorder %v646_v19, 0.0  ;;  %v774_v23 = vmul.f32 0.1, %v646_v19  ;;  %vm726_vm11 = vcmp.ge.f32.partialorder %v662_v20, 0.0  ;;  %v790_v24 = vmul.f32 0.1, %v662_v20 }
  0xad   : > { %v869_v25 = vsel %vm741_vm8, %v677_v17, %v805_v21  ;;  %v885_v26 = vsel %vm757_vm9, %v693_v18, %v821_v22 }
  0xae   : > { %934 = vst.msk [vmem:[%s1266_s14 + $0x108] sm:$0xff] %vm900_vm1, %v869_v25  ;;  %v838_v27 = vsel %vm710_vm10, %v646_v19, %v774_v23  ;;  %v854_v28 = vsel %vm726_vm11, %v662_v20, %v790_v24  ;;  %v499_v29 = vpop.f32.mrf.mxu2  ;;  %v539_v30 = vpop.f32.mrf.mxu3 }
  0xaf   : > { %950 = vst.msk [vmem:[%s1266_s14 + $0x188] sm:$0xff] %vm900_vm1, %v885_v26  ;;  %v610_v31 = vmul.f32 %v1250_v41, %v499_v29  ;;  %v626_v32 = vmul.f32 %v1250_v41, %v539_v30  ;;  %v421_v33 = vpop.f32.mrf.mxu0  ;;  %v461_v34 = vpop.f32.mrf.mxu1 }
  0xb0   : > { %903 = vst.msk [vmem:[%s1266_s14 + $0x10] sm:$0xff] %vm900_vm1, %v838_v27  ;;  %v579_v35 = vmul.f32 %v1250_v41, %v421_v33  ;;  %v595_v36 = vmul.f32 %v1250_v41, %v461_v34 }
  0xb1   : > { %919 = vst.msk [vmem:[%s1266_s14 + $0x90] sm:$0xff] %vm900_vm1, %v854_v28  ;;  %v678_v37 = vadd.f32 %v1255_v42, %v610_v31  ;;  %v694_v38 = vadd.f32 %v1255_v42, %v626_v32 }
  0xb2   : > { %v647_v39 = vadd.f32 %v1255_v42, %v579_v35  ;;  %v663_v40 = vadd.f32 %v1255_v42, %v595_v36 }
  0xb3   : > { %vm742_vm12 = vcmp.ge.f32.partialorder %v678_v37, 0.0  ;;  %v806_v43 = vmul.f32 0.1, %v678_v37  ;;  %vm758_vm13 = vcmp.ge.f32.partialorder %v694_v38, 0.0  ;;  %v822_v44 = vmul.f32 0.1, %v694_v38 }
  0xb4   : > { %vm711_vm14 = vcmp.ge.f32.partialorder %v647_v39, 0.0  ;;  %v775_v45 = vmul.f32 0.1, %v647_v39  ;;  %vm727_vm15 = vcmp.ge.f32.partialorder %v663_v40, 0.0  ;;  %v791_v46 = vmul.f32 0.1, %v663_v40 }
  0xb5   : > { %v870_v47 = vsel %vm742_vm12, %v678_v37, %v806_v43  ;;  %v886_v48 = vsel %vm758_vm13, %v694_v38, %v822_v44 }
  0xb6   : > { %935 = vst.msk [vmem:[%s1266_s14 + $0x110] sm:$0xff] %vm900_vm1, %v870_v47  ;;  %v839_v49 = vsel %vm711_vm14, %v647_v39, %v775_v45  ;;  %v855_v50 = vsel %vm727_vm15, %v663_v40, %v791_v46  ;;  %v501_v51 = vpop.f32.mrf.mxu2  ;;  %v541_v52 = vpop.f32.mrf.mxu3 }
  0xb7   : > { %951 = vst.msk [vmem:[%s1266_s14 + $0x190] sm:$0xff] %vm900_vm1, %v886_v48  ;;  %v611_v53 = vmul.f32 %v1250_v41, %v501_v51  ;;  %v627_v54 = vmul.f32 %v1250_v41, %v541_v52  ;;  %v424_v55 = vpop.f32.mrf.mxu0  ;;  %v464_v56 = vpop.f32.mrf.mxu1 }
  0xb8   : > { %904 = vst.msk [vmem:[%s1266_s14 + $0x18] sm:$0xff] %vm900_vm1, %v839_v49  ;;  %v580_v57 = vmul.f32 %v1250_v41, %v424_v55  ;;  %v596_v58 = vmul.f32 %v1250_v41, %v464_v56 }
  0xb9   : > { %920 = vst.msk [vmem:[%s1266_s14 + $0x98] sm:$0xff] %vm900_vm1, %v855_v50  ;;  %v679_v59 = vadd.f32 %v1255_v42, %v611_v53  ;;  %v695_v60 = vadd.f32 %v1255_v42, %v627_v54 }
  0xba   : > { %v648_v61 = vadd.f32 %v1255_v42, %v580_v57  ;;  %v664_v62 = vadd.f32 %v1255_v42, %v596_v58 }
  0xbb   : > { %vm743_vm0 = vcmp.ge.f32.partialorder %v679_v59, 0.0  ;;  %v807_v63 = vmul.f32 0.1, %v679_v59  ;;  %vm759_vm2 = vcmp.ge.f32.partialorder %v695_v60, 0.0  ;;  %v823_v0 = vmul.f32 0.1, %v695_v60 }
  0xbc   : > { %vm712_vm3 = vcmp.ge.f32.partialorder %v648_v61, 0.0  ;;  %v776_v1 = vmul.f32 0.1, %v648_v61  ;;  %vm728_vm4 = vcmp.ge.f32.partialorder %v664_v62, 0.0  ;;  %v792_v2 = vmul.f32 0.1, %v664_v62 }
  0xbd   : > { %v871_v3 = vsel %vm743_vm0, %v679_v59, %v807_v63  ;;  %v887_v4 = vsel %vm759_vm2, %v695_v60, %v823_v0 }
  0xbe   : > { %936 = vst.msk [vmem:[%s1266_s14 + $0x118] sm:$0xff] %vm900_vm1, %v871_v3  ;;  %v840_v5 = vsel %vm712_vm3, %v648_v61, %v776_v1  ;;  %v856_v6 = vsel %vm728_vm4, %v664_v62, %v792_v2  ;;  %v504_v7 = vpop.f32.mrf.mxu2  ;;  %v544_v8 = vpop.f32.mrf.mxu3 }
  0xbf   : > { %952 = vst.msk [vmem:[%s1266_s14 + $0x198] sm:$0xff] %vm900_vm1, %v887_v4  ;;  %v612_v9 = vmul.f32 %v1250_v41, %v504_v7  ;;  %v628_v10 = vmul.f32 %v1250_v41, %v544_v8  ;;  %v426_v11 = vpop.f32.mrf.mxu0  ;;  %v466_v12 = vpop.f32.mrf.mxu1 }
  0xc0   : > { %905 = vst.msk [vmem:[%s1266_s14 + $0x20] sm:$0xff] %vm900_vm1, %v840_v5  ;;  %v581_v13 = vmul.f32 %v1250_v41, %v426_v11  ;;  %v597_v14 = vmul.f32 %v1250_v41, %v466_v12 }
  0xc1   : > { %921 = vst.msk [vmem:[%s1266_s14 + $0xa0] sm:$0xff] %vm900_vm1, %v856_v6  ;;  %v680_v15 = vadd.f32 %v1255_v42, %v612_v9  ;;  %v696_v16 = vadd.f32 %v1255_v42, %v628_v10 }
  0xc2   : > { %v649_v17 = vadd.f32 %v1255_v42, %v581_v13  ;;  %v665_v18 = vadd.f32 %v1255_v42, %v597_v14 }
  0xc3   : > { %vm744_vm5 = vcmp.ge.f32.partialorder %v680_v15, 0.0  ;;  %v808_v19 = vmul.f32 0.1, %v680_v15  ;;  %vm760_vm6 = vcmp.ge.f32.partialorder %v696_v16, 0.0  ;;  %v824_v20 = vmul.f32 0.1, %v696_v16 }
  0xc4   : > { %vm713_vm7 = vcmp.ge.f32.partialorder %v649_v17, 0.0  ;;  %v777_v21 = vmul.f32 0.1, %v649_v17  ;;  %vm729_vm8 = vcmp.ge.f32.partialorder %v665_v18, 0.0  ;;  %v793_v22 = vmul.f32 0.1, %v665_v18 }
  0xc5   : > { %v872_v23 = vsel %vm744_vm5, %v680_v15, %v808_v19  ;;  %v888_v24 = vsel %vm760_vm6, %v696_v16, %v824_v20 }
  0xc6   : > { %937 = vst.msk [vmem:[%s1266_s14 + $0x120] sm:$0xff] %vm900_vm1, %v872_v23  ;;  %v841_v25 = vsel %vm713_vm7, %v649_v17, %v777_v21  ;;  %v857_v26 = vsel %vm729_vm8, %v665_v18, %v793_v22  ;;  %v506_v27 = vpop.f32.mrf.mxu2  ;;  %v546_v28 = vpop.f32.mrf.mxu3 }
  0xc7   : > { %953 = vst.msk [vmem:[%s1266_s14 + $0x1a0] sm:$0xff] %vm900_vm1, %v888_v24  ;;  %v613_v29 = vmul.f32 %v1250_v41, %v506_v27  ;;  %v629_v30 = vmul.f32 %v1250_v41, %v546_v28  ;;  %v429_v31 = vpop.f32.mrf.mxu0  ;;  %v469_v32 = vpop.f32.mrf.mxu1 }
  0xc8   : > { %906 = vst.msk [vmem:[%s1266_s14 + $0x28] sm:$0xff] %vm900_vm1, %v841_v25  ;;  %v582_v33 = vmul.f32 %v1250_v41, %v429_v31  ;;  %v598_v34 = vmul.f32 %v1250_v41, %v469_v32 }
  0xc9   : > { %922 = vst.msk [vmem:[%s1266_s14 + $0xa8] sm:$0xff] %vm900_vm1, %v857_v26  ;;  %v681_v35 = vadd.f32 %v1255_v42, %v613_v29  ;;  %v697_v36 = vadd.f32 %v1255_v42, %v629_v30 }
  0xca   : > { %v650_v37 = vadd.f32 %v1255_v42, %v582_v33  ;;  %v666_v38 = vadd.f32 %v1255_v42, %v598_v34 }
  0xcb   : > { %vm745_vm9 = vcmp.ge.f32.partialorder %v681_v35, 0.0  ;;  %v809_v39 = vmul.f32 0.1, %v681_v35  ;;  %vm761_vm10 = vcmp.ge.f32.partialorder %v697_v36, 0.0  ;;  %v825_v40 = vmul.f32 0.1, %v697_v36 }
  0xcc   : > { %vm714_vm11 = vcmp.ge.f32.partialorder %v650_v37, 0.0  ;;  %v778_v43 = vmul.f32 0.1, %v650_v37  ;;  %vm730_vm12 = vcmp.ge.f32.partialorder %v666_v38, 0.0  ;;  %v794_v44 = vmul.f32 0.1, %v666_v38 }
  0xcd   : > { %v873_v45 = vsel %vm745_vm9, %v681_v35, %v809_v39  ;;  %v889_v46 = vsel %vm761_vm10, %v697_v36, %v825_v40 }
  0xce   : > { %938 = vst.msk [vmem:[%s1266_s14 + $0x128] sm:$0xff] %vm900_vm1, %v873_v45  ;;  %v842_v47 = vsel %vm714_vm11, %v650_v37, %v778_v43  ;;  %v858_v48 = vsel %vm730_vm12, %v666_v38, %v794_v44  ;;  %v509_v49 = vpop.f32.mrf.mxu2  ;;  %v549_v50 = vpop.f32.mrf.mxu3 }
  0xcf   : > { %954 = vst.msk [vmem:[%s1266_s14 + $0x1a8] sm:$0xff] %vm900_vm1, %v889_v46  ;;  %v614_v51 = vmul.f32 %v1250_v41, %v509_v49  ;;  %v630_v52 = vmul.f32 %v1250_v41, %v549_v50  ;;  %v431_v53 = vpop.f32.mrf.mxu0  ;;  %v471_v54 = vpop.f32.mrf.mxu1 }
  0xd0   : > { %907 = vst.msk [vmem:[%s1266_s14 + $0x30] sm:$0xff] %vm900_vm1, %v842_v47  ;;  %v583_v55 = vmul.f32 %v1250_v41, %v431_v53  ;;  %v599_v56 = vmul.f32 %v1250_v41, %v471_v54 }
  0xd1   : > { %923 = vst.msk [vmem:[%s1266_s14 + $0xb0] sm:$0xff] %vm900_vm1, %v858_v48  ;;  %v682_v57 = vadd.f32 %v1255_v42, %v614_v51  ;;  %v698_v58 = vadd.f32 %v1255_v42, %v630_v52 }
  0xd2   : > { %v651_v59 = vadd.f32 %v1255_v42, %v583_v55  ;;  %v667_v60 = vadd.f32 %v1255_v42, %v599_v56 }
  0xd3   : > { %vm746_vm13 = vcmp.ge.f32.partialorder %v682_v57, 0.0  ;;  %v810_v61 = vmul.f32 0.1, %v682_v57  ;;  %vm762_vm14 = vcmp.ge.f32.partialorder %v698_v58, 0.0  ;;  %v826_v62 = vmul.f32 0.1, %v698_v58 }
  0xd4   : > { %vm715_vm15 = vcmp.ge.f32.partialorder %v651_v59, 0.0  ;;  %v779_v63 = vmul.f32 0.1, %v651_v59  ;;  %vm731_vm0 = vcmp.ge.f32.partialorder %v667_v60, 0.0  ;;  %v795_v0 = vmul.f32 0.1, %v667_v60 }
  0xd5   : > { %v874_v1 = vsel %vm746_vm13, %v682_v57, %v810_v61  ;;  %v890_v2 = vsel %vm762_vm14, %v698_v58, %v826_v62 }
  0xd6   : > { %939 = vst.msk [vmem:[%s1266_s14 + $0x130] sm:$0xff] %vm900_vm1, %v874_v1  ;;  %v843_v3 = vsel %vm715_vm15, %v651_v59, %v779_v63  ;;  %v859_v4 = vsel %vm731_vm0, %v667_v60, %v795_v0  ;;  %v511_v5 = vpop.f32.mrf.mxu2  ;;  %v551_v6 = vpop.f32.mrf.mxu3 }
  0xd7   : > { %955 = vst.msk [vmem:[%s1266_s14 + $0x1b0] sm:$0xff] %vm900_vm1, %v890_v2  ;;  %v615_v7 = vmul.f32 %v1250_v41, %v511_v5  ;;  %v631_v8 = vmul.f32 %v1250_v41, %v551_v6  ;;  %v434_v9 = vpop.f32.mrf.mxu0  ;;  %v474_v10 = vpop.f32.mrf.mxu1 }
  0xd8   : > { %908 = vst.msk [vmem:[%s1266_s14 + $0x38] sm:$0xff] %vm900_vm1, %v843_v3  ;;  %v584_v11 = vmul.f32 %v1250_v41, %v434_v9  ;;  %v600_v12 = vmul.f32 %v1250_v41, %v474_v10 }
  0xd9   : > { %924 = vst.msk [vmem:[%s1266_s14 + $0xb8] sm:$0xff] %vm900_vm1, %v859_v4  ;;  %v683_v13 = vadd.f32 %v1255_v42, %v615_v7  ;;  %v699_v14 = vadd.f32 %v1255_v42, %v631_v8 }
  0xda   : > { %v652_v15 = vadd.f32 %v1255_v42, %v584_v11  ;;  %v668_v16 = vadd.f32 %v1255_v42, %v600_v12 }
  0xdb   : > { %vm747_vm2 = vcmp.ge.f32.partialorder %v683_v13, 0.0  ;;  %v811_v17 = vmul.f32 0.1, %v683_v13  ;;  %vm763_vm3 = vcmp.ge.f32.partialorder %v699_v14, 0.0  ;;  %v827_v18 = vmul.f32 0.1, %v699_v14 }
  0xdc   : > { %vm716_vm4 = vcmp.ge.f32.partialorder %v652_v15, 0.0  ;;  %v780_v19 = vmul.f32 0.1, %v652_v15  ;;  %vm732_vm5 = vcmp.ge.f32.partialorder %v668_v16, 0.0  ;;  %v796_v20 = vmul.f32 0.1, %v668_v16 }
  0xdd   : > { %v875_v21 = vsel %vm747_vm2, %v683_v13, %v811_v17  ;;  %v891_v22 = vsel %vm763_vm3, %v699_v14, %v827_v18 }
  0xde   : > { %940 = vst.msk [vmem:[%s1266_s14 + $0x138] sm:$0xff] %vm900_vm1, %v875_v21  ;;  %v844_v23 = vsel %vm716_vm4, %v652_v15, %v780_v19  ;;  %v860_v24 = vsel %vm732_vm5, %v668_v16, %v796_v20  ;;  %v514_v25 = vpop.f32.mrf.mxu2  ;;  %v554_v26 = vpop.f32.mrf.mxu3 }
  0xdf   : > { %956 = vst.msk [vmem:[%s1266_s14 + $0x1b8] sm:$0xff] %vm900_vm1, %v891_v22  ;;  %v616_v27 = vmul.f32 %v1250_v41, %v514_v25  ;;  %v632_v28 = vmul.f32 %v1250_v41, %v554_v26  ;;  %v436_v29 = vpop.f32.mrf.mxu0  ;;  %v476_v30 = vpop.f32.mrf.mxu1 }
  0xe0   : > { %909 = vst.msk [vmem:[%s1266_s14 + $0x40] sm:$0xff] %vm900_vm1, %v844_v23  ;;  %v585_v31 = vmul.f32 %v1250_v41, %v436_v29  ;;  %v601_v32 = vmul.f32 %v1250_v41, %v476_v30 }
  0xe1   : > { %925 = vst.msk [vmem:[%s1266_s14 + $0xc0] sm:$0xff] %vm900_vm1, %v860_v24  ;;  %v684_v33 = vadd.f32 %v1255_v42, %v616_v27  ;;  %v700_v34 = vadd.f32 %v1255_v42, %v632_v28 }
  0xe2   : > { %v653_v35 = vadd.f32 %v1255_v42, %v585_v31  ;;  %v669_v36 = vadd.f32 %v1255_v42, %v601_v32 }
  0xe3   : > { %vm748_vm6 = vcmp.ge.f32.partialorder %v684_v33, 0.0  ;;  %v812_v37 = vmul.f32 0.1, %v684_v33  ;;  %vm764_vm7 = vcmp.ge.f32.partialorder %v700_v34, 0.0  ;;  %v828_v38 = vmul.f32 0.1, %v700_v34 }
  0xe4   : > { %vm717_vm8 = vcmp.ge.f32.partialorder %v653_v35, 0.0  ;;  %v781_v39 = vmul.f32 0.1, %v653_v35  ;;  %vm733_vm9 = vcmp.ge.f32.partialorder %v669_v36, 0.0  ;;  %v797_v40 = vmul.f32 0.1, %v669_v36 }
  0xe5   : > { %v876_v43 = vsel %vm748_vm6, %v684_v33, %v812_v37  ;;  %v892_v44 = vsel %vm764_vm7, %v700_v34, %v828_v38 }
  0xe6   : > { %941 = vst.msk [vmem:[%s1266_s14 + $0x140] sm:$0xff] %vm900_vm1, %v876_v43  ;;  %v845_v45 = vsel %vm717_vm8, %v653_v35, %v781_v39  ;;  %v861_v46 = vsel %vm733_vm9, %v669_v36, %v797_v40  ;;  %v516_v47 = vpop.f32.mrf.mxu2  ;;  %v556_v48 = vpop.f32.mrf.mxu3 }
  0xe7   : > { %957 = vst.msk [vmem:[%s1266_s14 + $0x1c0] sm:$0xff] %vm900_vm1, %v892_v44  ;;  %v617_v49 = vmul.f32 %v1250_v41, %v516_v47  ;;  %v633_v50 = vmul.f32 %v1250_v41, %v556_v48  ;;  %v439_v51 = vpop.f32.mrf.mxu0  ;;  %v479_v52 = vpop.f32.mrf.mxu1 }
  0xe8   : > { %910 = vst.msk [vmem:[%s1266_s14 + $0x48] sm:$0xff] %vm900_vm1, %v845_v45  ;;  %v586_v53 = vmul.f32 %v1250_v41, %v439_v51  ;;  %v602_v54 = vmul.f32 %v1250_v41, %v479_v52 }
  0xe9   : > { %926 = vst.msk [vmem:[%s1266_s14 + $0xc8] sm:$0xff] %vm900_vm1, %v861_v46  ;;  %v685_v55 = vadd.f32 %v1255_v42, %v617_v49  ;;  %v701_v56 = vadd.f32 %v1255_v42, %v633_v50 }
  0xea   : > { %v654_v57 = vadd.f32 %v1255_v42, %v586_v53  ;;  %v670_v58 = vadd.f32 %v1255_v42, %v602_v54 }
  0xeb   : > { %vm749_vm10 = vcmp.ge.f32.partialorder %v685_v55, 0.0  ;;  %v813_v59 = vmul.f32 0.1, %v685_v55  ;;  %vm765_vm11 = vcmp.ge.f32.partialorder %v701_v56, 0.0  ;;  %v829_v60 = vmul.f32 0.1, %v701_v56 }
  0xec   : > { %vm718_vm12 = vcmp.ge.f32.partialorder %v654_v57, 0.0  ;;  %v782_v61 = vmul.f32 0.1, %v654_v57  ;;  %vm734_vm13 = vcmp.ge.f32.partialorder %v670_v58, 0.0  ;;  %v798_v62 = vmul.f32 0.1, %v670_v58 }
  0xed   : > { %v877_v63 = vsel %vm749_vm10, %v685_v55, %v813_v59  ;;  %v893_v0 = vsel %vm765_vm11, %v701_v56, %v829_v60 }
  0xee   : > { %942 = vst.msk [vmem:[%s1266_s14 + $0x148] sm:$0xff] %vm900_vm1, %v877_v63  ;;  %v846_v1 = vsel %vm718_vm12, %v654_v57, %v782_v61  ;;  %v862_v2 = vsel %vm734_vm13, %v670_v58, %v798_v62  ;;  %v519_v3 = vpop.f32.mrf.mxu2  ;;  %v559_v4 = vpop.f32.mrf.mxu3 }
  0xef   : > { %958 = vst.msk [vmem:[%s1266_s14 + $0x1c8] sm:$0xff] %vm900_vm1, %v893_v0  ;;  %v618_v5 = vmul.f32 %v1250_v41, %v519_v3  ;;  %v634_v6 = vmul.f32 %v1250_v41, %v559_v4  ;;  %v441_v7 = vpop.f32.mrf.mxu0  ;;  %v481_v8 = vpop.f32.mrf.mxu1 }
  0xf0   : > { %911 = vst.msk [vmem:[%s1266_s14 + $0x50] sm:$0xff] %vm900_vm1, %v846_v1  ;;  %v587_v9 = vmul.f32 %v1250_v41, %v441_v7  ;;  %v603_v10 = vmul.f32 %v1250_v41, %v481_v8 }
  0xf1   : > { %927 = vst.msk [vmem:[%s1266_s14 + $0xd0] sm:$0xff] %vm900_vm1, %v862_v2  ;;  %v686_v11 = vadd.f32 %v1255_v42, %v618_v5  ;;  %v702_v12 = vadd.f32 %v1255_v42, %v634_v6 }
  0xf2   : > { %v655_v13 = vadd.f32 %v1255_v42, %v587_v9  ;;  %v671_v14 = vadd.f32 %v1255_v42, %v603_v10 }
  0xf3   : > { %vm750_vm14 = vcmp.ge.f32.partialorder %v686_v11, 0.0  ;;  %v814_v15 = vmul.f32 0.1, %v686_v11  ;;  %vm766_vm15 = vcmp.ge.f32.partialorder %v702_v12, 0.0  ;;  %v830_v16 = vmul.f32 0.1, %v702_v12 }
  0xf4   : > { %vm719_vm0 = vcmp.ge.f32.partialorder %v655_v13, 0.0  ;;  %v783_v17 = vmul.f32 0.1, %v655_v13  ;;  %vm735_vm2 = vcmp.ge.f32.partialorder %v671_v14, 0.0  ;;  %v799_v18 = vmul.f32 0.1, %v671_v14 }
  0xf5   : > { %v878_v19 = vsel %vm750_vm14, %v686_v11, %v814_v15  ;;  %v894_v20 = vsel %vm766_vm15, %v702_v12, %v830_v16 }
  0xf6   : > { %943 = vst.msk [vmem:[%s1266_s14 + $0x150] sm:$0xff] %vm900_vm1, %v878_v19  ;;  %v847_v21 = vsel %vm719_vm0, %v655_v13, %v783_v17  ;;  %v863_v22 = vsel %vm735_vm2, %v671_v14, %v799_v18  ;;  %v521_v23 = vpop.f32.mrf.mxu2  ;;  %v561_v24 = vpop.f32.mrf.mxu3 }
  0xf7   : > { %959 = vst.msk [vmem:[%s1266_s14 + $0x1d0] sm:$0xff] %vm900_vm1, %v894_v20  ;;  %v619_v25 = vmul.f32 %v1250_v41, %v521_v23  ;;  %v635_v26 = vmul.f32 %v1250_v41, %v561_v24  ;;  %v444_v27 = vpop.f32.mrf.mxu0  ;;  %v484_v28 = vpop.f32.mrf.mxu1 }
  0xf8   : > { %912 = vst.msk [vmem:[%s1266_s14 + $0x58] sm:$0xff] %vm900_vm1, %v847_v21  ;;  %v588_v29 = vmul.f32 %v1250_v41, %v444_v27  ;;  %v604_v30 = vmul.f32 %v1250_v41, %v484_v28 }
  0xf9   : > { %928 = vst.msk [vmem:[%s1266_s14 + $0xd8] sm:$0xff] %vm900_vm1, %v863_v22  ;;  %v687_v31 = vadd.f32 %v1255_v42, %v619_v25  ;;  %v703_v32 = vadd.f32 %v1255_v42, %v635_v26 }
  0xfa   : > { %v656_v33 = vadd.f32 %v1255_v42, %v588_v29  ;;  %v672_v34 = vadd.f32 %v1255_v42, %v604_v30 }
  0xfb   : > { %vm751_vm3 = vcmp.ge.f32.partialorder %v687_v31, 0.0  ;;  %v815_v35 = vmul.f32 0.1, %v687_v31  ;;  %vm767_vm4 = vcmp.ge.f32.partialorder %v703_v32, 0.0  ;;  %v831_v36 = vmul.f32 0.1, %v703_v32 }
  0xfc   : > { %vm720_vm5 = vcmp.ge.f32.partialorder %v656_v33, 0.0  ;;  %v784_v37 = vmul.f32 0.1, %v656_v33  ;;  %vm736_vm6 = vcmp.ge.f32.partialorder %v672_v34, 0.0  ;;  %v800_v38 = vmul.f32 0.1, %v672_v34 }
  0xfd   : > { %v879_v39 = vsel %vm751_vm3, %v687_v31, %v815_v35  ;;  %v895_v40 = vsel %vm767_vm4, %v703_v32, %v831_v36 }
  0xfe   : > { %944 = vst.msk [vmem:[%s1266_s14 + $0x158] sm:$0xff] %vm900_vm1, %v879_v39  ;;  %v848_v43 = vsel %vm720_vm5, %v656_v33, %v784_v37  ;;  %v864_v44 = vsel %vm736_vm6, %v672_v34, %v800_v38  ;;  %v524_v45 = vpop.f32.mrf.mxu2  ;;  %v564_v46 = vpop.f32.mrf.mxu3 }
  0xff   : > { %960 = vst.msk [vmem:[%s1266_s14 + $0x1d8] sm:$0xff] %vm900_vm1, %v895_v40  ;;  %v620_v47 = vmul.f32 %v1250_v41, %v524_v45  ;;  %v636_v48 = vmul.f32 %v1250_v41, %v564_v46  ;;  %v446_v49 = vpop.f32.mrf.mxu0  ;;  %v486_v50 = vpop.f32.mrf.mxu1 }
 0x100   : > { %913 = vst.msk [vmem:[%s1266_s14 + $0x60] sm:$0xff] %vm900_vm1, %v848_v43  ;;  %v589_v51 = vmul.f32 %v1250_v41, %v446_v49  ;;  %v605_v52 = vmul.f32 %v1250_v41, %v486_v50 }
 0x101   : > { %929 = vst.msk [vmem:[%s1266_s14 + $0xe0] sm:$0xff] %vm900_vm1, %v864_v44  ;;  %v688_v53 = vadd.f32 %v1255_v42, %v620_v47  ;;  %v704_v54 = vadd.f32 %v1255_v42, %v636_v48 }
 0x102   : > { %v657_v55 = vadd.f32 %v1255_v42, %v589_v51  ;;  %v673_v56 = vadd.f32 %v1255_v42, %v605_v52 }
 0x103   : > { %vm752_vm7 = vcmp.ge.f32.partialorder %v688_v53, 0.0  ;;  %v816_v57 = vmul.f32 0.1, %v688_v53  ;;  %vm768_vm8 = vcmp.ge.f32.partialorder %v704_v54, 0.0  ;;  %v832_v58 = vmul.f32 0.1, %v704_v54 }
 0x104   : > { %vm721_vm9 = vcmp.ge.f32.partialorder %v657_v55, 0.0  ;;  %v785_v59 = vmul.f32 0.1, %v657_v55  ;;  %vm737_vm10 = vcmp.ge.f32.partialorder %v673_v56, 0.0  ;;  %v801_v60 = vmul.f32 0.1, %v673_v56 }
 0x105   : > { %v880_v61 = vsel %vm752_vm7, %v688_v53, %v816_v57  ;;  %v896_v62 = vsel %vm768_vm8, %v704_v54, %v832_v58 }
 0x106   : > { %945 = vst.msk [vmem:[%s1266_s14 + $0x160] sm:$0xff] %vm900_vm1, %v880_v61  ;;  %v849_v63 = vsel %vm721_vm9, %v657_v55, %v785_v59  ;;  %v865_v0 = vsel %vm737_vm10, %v673_v56, %v801_v60  ;;  %v526_v1 = vpop.f32.mrf.mxu2  ;;  %v566_v2 = vpop.f32.mrf.mxu3 }
 0x107   : > { %961 = vst.msk [vmem:[%s1266_s14 + $0x1e0] sm:$0xff] %vm900_vm1, %v896_v62  ;;  %v621_v3 = vmul.f32 %v1250_v41, %v526_v1  ;;  %v637_v4 = vmul.f32 %v1250_v41, %v566_v2  ;;  %v449_v5 = vpop.f32.mrf.mxu0  ;;  %v489_v6 = vpop.f32.mrf.mxu1 }
 0x108   : > { %914 = vst.msk [vmem:[%s1266_s14 + $0x68] sm:$0xff] %vm900_vm1, %v849_v63  ;;  %v590_v7 = vmul.f32 %v1250_v41, %v449_v5  ;;  %v606_v8 = vmul.f32 %v1250_v41, %v489_v6 }
 0x109   : > { %930 = vst.msk [vmem:[%s1266_s14 + $0xe8] sm:$0xff] %vm900_vm1, %v865_v0  ;;  %v689_v9 = vadd.f32 %v1255_v42, %v621_v3  ;;  %v705_v10 = vadd.f32 %v1255_v42, %v637_v4 }
 0x10a   : > { %v658_v11 = vadd.f32 %v1255_v42, %v590_v7  ;;  %v674_v12 = vadd.f32 %v1255_v42, %v606_v8 }
 0x10b   : > { %vm753_vm11 = vcmp.ge.f32.partialorder %v689_v9, 0.0  ;;  %v817_v13 = vmul.f32 0.1, %v689_v9  ;;  %vm769_vm12 = vcmp.ge.f32.partialorder %v705_v10, 0.0  ;;  %v833_v14 = vmul.f32 0.1, %v705_v10 }
 0x10c   : > { %vm722_vm13 = vcmp.ge.f32.partialorder %v658_v11, 0.0  ;;  %v786_v15 = vmul.f32 0.1, %v658_v11  ;;  %vm738_vm14 = vcmp.ge.f32.partialorder %v674_v12, 0.0  ;;  %v802_v16 = vmul.f32 0.1, %v674_v12 }
 0x10d   : > { %v881_v17 = vsel %vm753_vm11, %v689_v9, %v817_v13  ;;  %v897_v18 = vsel %vm769_vm12, %v705_v10, %v833_v14 }
 0x10e   : > { %946 = vst.msk [vmem:[%s1266_s14 + $0x168] sm:$0xff] %vm900_vm1, %v881_v17  ;;  %v850_v19 = vsel %vm722_vm13, %v658_v11, %v786_v15  ;;  %v866_v20 = vsel %vm738_vm14, %v674_v12, %v802_v16  ;;  %v529_v21 = vpop.f32.mrf.mxu2  ;;  %v569_v22 = vpop.f32.mrf.mxu3 }
 0x10f   : > { %962 = vst.msk [vmem:[%s1266_s14 + $0x1e8] sm:$0xff] %vm900_vm1, %v897_v18  ;;  %v622_v23 = vmul.f32 %v1250_v41, %v529_v21  ;;  %v638_v24 = vmul.f32 %v1250_v41, %v569_v22  ;;  %v451_v25 = vpop.f32.mrf.mxu0  ;;  %v491_v26 = vpop.f32.mrf.mxu1 }
 0x110   : > { %915 = vst.msk [vmem:[%s1266_s14 + $0x70] sm:$0xff] %vm900_vm1, %v850_v19  ;;  %v591_v27 = vmul.f32 %v1250_v41, %v451_v25  ;;  %v607_v28 = vmul.f32 %v1250_v41, %v491_v26 }
 0x111   : > { %931 = vst.msk [vmem:[%s1266_s14 + $0xf0] sm:$0xff] %vm900_vm1, %v866_v20  ;;  %v690_v29 = vadd.f32 %v1255_v42, %v622_v23  ;;  %v706_v30 = vadd.f32 %v1255_v42, %v638_v24 }
 0x112   : > { %v659_v31 = vadd.f32 %v1255_v42, %v591_v27  ;;  %v675_v32 = vadd.f32 %v1255_v42, %v607_v28 }
 0x113   : > { %vm754_vm15 = vcmp.ge.f32.partialorder %v690_v29, 0.0  ;;  %v818_v33 = vmul.f32 0.1, %v690_v29  ;;  %vm770_vm0 = vcmp.ge.f32.partialorder %v706_v30, 0.0  ;;  %v834_v34 = vmul.f32 0.1, %v706_v30 }
 0x114   : > { %vm723_vm2 = vcmp.ge.f32.partialorder %v659_v31, 0.0  ;;  %v787_v35 = vmul.f32 0.1, %v659_v31  ;;  %vm739_vm3 = vcmp.ge.f32.partialorder %v675_v32, 0.0  ;;  %v803_v36 = vmul.f32 0.1, %v675_v32 }
 0x115   : > { %v882_v37 = vsel %vm754_vm15, %v690_v29, %v818_v33  ;;  %v898_v38 = vsel %vm770_vm0, %v706_v30, %v834_v34 }
 0x116   : > { %947 = vst.msk [vmem:[%s1266_s14 + $0x170] sm:$0xff] %vm900_vm1, %v882_v37  ;;  %v851_v39 = vsel %vm723_vm2, %v659_v31, %v787_v35  ;;  %v867_v40 = vsel %vm739_vm3, %v675_v32, %v803_v36  ;;  %v531_v43 = vpop.f32.mrf.mxu2  ;;  %v571_v44 = vpop.f32.mrf.mxu3 }
 0x117   : > { %963 = vst.msk [vmem:[%s1266_s14 + $0x1f0] sm:$0xff] %vm900_vm1, %v898_v38  ;;  %v623_v45 = vmul.f32 %v1250_v41, %v531_v43  ;;  %v639_v46 = vmul.f32 %v1250_v41, %v571_v44 }
 0x118   : > { %916 = vst.msk [vmem:[%s1266_s14 + $0x78] sm:$0xff] %vm900_vm1, %v851_v39 }
 0x119   : > { %932 = vst.msk [vmem:[%s1266_s14 + $0xf8] sm:$0xff] %vm900_vm1, %v867_v40  ;;  %v691_v47 = vadd.f32 %v1255_v42, %v623_v45  ;;  %v707_v48 = vadd.f32 %v1255_v42, %v639_v46 }
 0x11b   : > { %vm755_vm4 = vcmp.ge.f32.partialorder %v691_v47, 0.0  ;;  %v819_v49 = vmul.f32 0.1, %v691_v47  ;;  %vm771_vm5 = vcmp.ge.f32.partialorder %v707_v48, 0.0  ;;  %v835_v50 = vmul.f32 0.1, %v707_v48 }
 0x11d   : > { %v883_v51 = vsel %vm755_vm4, %v691_v47, %v819_v49  ;;  %v899_v52 = vsel %vm771_vm5, %v707_v48, %v835_v50 }
 0x11e   : > { %948 = vst.msk [vmem:[%s1266_s14 + $0x178] sm:$0xff] %vm900_vm1, %v883_v51 }
 0x11f   : > { %964 = vst.msk [vmem:[%s1266_s14 + $0x1f8] sm:$0xff] %vm900_vm1, %v899_v52 }
 0x120 PF: > { %s15_s17 = sadd.s32 1, %s1088_s17  }
 0x121   : > { %p12_p4 = scmp.ge.s32.totalorder %s15_s17, 6  }
 0x123   :  { %14 = sbr.rel (!%p12_p4) target bundleno = 2 (0x2), region = 66 }

// kernel: discriminator_forward.6
= control target key start
LH: loop header
LB: loop body
LE: loop exit
PB: predicated region body
PF: predicated region fallthrough
CT: control target
= control target key end

     0   :  { %s698_s17 = smov 0   ;;  %s941_s0 = inlined_call_operand.<no memory space> [shape: f32[1], index: 0, kind: input, shape index: {}]   ;;  %s942_s1 = inlined_call_operand.vmem [shape: f32[512,128], index: 1, kind: input, shape index: {}]   ;;  %s943_s2 = inlined_call_operand.vmem [shape: f32[128,16], index: 2, kind: input, shape index: {}]   ;;  %s944_s3 = inlined_call_operand.vmem [shape: f32[1,16], index: 3, kind: input, shape index: {}]   ;;  %s945_s4 = inlined_call_operand.vmem [shape: f32[512,16], index: 4, kind: output, shape index: {}]  }
   0x1   :  { %9 = sst [smem:[#allocation2]] %s941_s0 }
   0x2 LB: > { %s618_s18 = sadd.s32 4294967295, %s668_s17   ;;  %p622_p0 = scmp.ge.s32.totalorder %s668_s17, 1  ;;  %s668_s17 = sphi %s698_s17, %s15_s17  }
   0x3   : > { %p164_p1 = scmp.lt.s32.totalorder %s668_s17, 3 }
   0x5   : > { %p165_p2 = pnand %p622_p0, %p164_p1 }
   0x6   : > { %s623_s8 = sshll.u32 (!%p165_p2), %s618_s18, 5  ;;  %s363_s29 = sld [smem:[#allocation2]] (!%p165_p2) }
   0x7   : > { %168 = sbr.rel (%p165_p2) target bundleno = 244 (0xf4), region = 36  ;;  %p191_p3 = scmp.lt.s32.totalorder (!%p165_p2), %s623_s8, 63 }
   0xc   : > { %v264_v0 = vld [vmem:[%s943_s2 + $0x70] sm:$0xff]  ;;  %v265_v1 = vld [vmem:[%s943_s2 + $0x78] sm:$0xff]  ;;  %v262_v2 = vld [vmem:[%s943_s2 + $0x60] sm:$0xff]  ;;  %s947_s8 = smov (!%p191_p3, %s623_s8), 63  ;;  %vm529_vm0 = vcmask 130048  }
   0xd   : > { %v273_v3 = vpack.c.bf16 %v265_v1, %v264_v0  ;;  %v263_v4 = vld [vmem:[%s943_s2 + $0x68] sm:$0xff]  ;;  %v260_v6 = vld [vmem:[%s943_s2 + $0x50] sm:$0xff]  ;;  %v261_v7 = vld [vmem:[%s943_s2 + $0x58] sm:$0xff]  ;;  %s624_s21 = sshll.u32 %s947_s8, 3 }
   0xe   : > { %v272_v5 = vpack.c.bf16 %v263_v4, %v262_v2  ;;  %v271_v8 = vpack.c.bf16 %v261_v7, %v260_v6  ;;  %v258_v9 = vld [vmem:[%s943_s2 + $0x40] sm:$0xff]  ;;  %v259_v10 = vld [vmem:[%s943_s2 + $0x48] sm:$0xff]  ;;  %v256_v12 = vld [vmem:[%s943_s2 + $0x30] sm:$0xff]  ;;  %s756_s24 = scalar_lea.vmem %s942_s1, %s624_s21  ;;  %s812_s9 = scalar_lea.vmem %s945_s4, %s624_s21 }
   0xf   : > { %274 = vmatpush.bf16.msra.mxu0 %v273_v3  ;;  %629 = vmatpush.bf16.msra.mxu1 %v273_v3  ;;  %v270_v11 = vpack.c.bf16 %v259_v10, %v258_v9  ;;  %v257_v13 = vld [vmem:[%s943_s2 + $0x38] sm:$0xff]  ;;  %v254_v15 = vld [vmem:[%s943_s2 + $0x20] sm:$0xff]  ;;  %v255_v16 = vld [vmem:[%s943_s2 + $0x28] sm:$0xff] }
  0x10   : > { %630 = vmatpush.bf16.msra.mxu2 %v273_v3  ;;  %631 = vmatpush.bf16.msra.mxu3 %v273_v3  ;;  %v269_v14 = vpack.c.bf16 %v257_v13, %v256_v12  ;;  %v268_v17 = vpack.c.bf16 %v255_v16, %v254_v15  ;;  %v252_v18 = vld [vmem:[%s943_s2 + $0x10] sm:$0xff]  ;;  %v253_v19 = vld [vmem:[%s943_s2 + $0x18] sm:$0xff]  ;;  %v250_v21 = vld [vmem:[%s943_s2] sm:$0xff] }
  0x11   : > { %v267_v20 = vpack.c.bf16 %v253_v19, %v252_v18  ;;  %v251_v22 = vld [vmem:[%s943_s2 + $0x8] sm:$0xff]  ;;  %v202_v23 = vld [vmem:[%s756_s24] sm:$0xff]  ;;  %v204_v36 = vld [vmem:[%s756_s24 + $0x10] sm:$0xff] }
  0x12   : > { %v203_v24 = vld [vmem:[%s756_s24 + $0x8] sm:$0xff]  ;;  %v266_v25 = vpack.c.bf16 %v251_v22, %v250_v21  ;;  %v210_v26 = vld [vmem:[%s756_s24 + $0x40] sm:$0xff]  ;;  %v205_v37 = vld [vmem:[%s756_s24 + $0x18] sm:$0xff] }
  0x13   : > { %275 = vmatpush.bf16.msra.mxu0 %v272_v5  ;;  %632 = vmatpush.bf16.msra.mxu1 %v272_v5  ;;  %v211_v27 = vld [vmem:[%s756_s24 + $0x48] sm:$0xff]  ;;  %v218_v28 = vld [vmem:[%s756_s24 + $0x80] sm:$0xff]  ;;  %v234_v32 = vpack.c.bf16 %v203_v24, %v202_v23  ;;  %v212_v38 = vld [vmem:[%s756_s24 + $0x50] sm:$0xff]  ;;  %v235_v44 = vpack.c.bf16 %v205_v37, %v204_v36 }
  0x14   : > { %633 = vmatpush.bf16.msra.mxu2 %v272_v5  ;;  %634 = vmatpush.bf16.msra.mxu3 %v272_v5  ;;  %v219_v29 = vld [vmem:[%s756_s24 + $0x88] sm:$0xff]  ;;  %v226_v30 = vld [vmem:[%s756_s24 + $0xc0] sm:$0xff]  ;;  %v238_v33 = vpack.c.bf16 %v211_v27, %v210_v26  ;;  %v213_v39 = vld [vmem:[%s756_s24 + $0x58] sm:$0xff] }
  0x15   : > { %v227_v31 = vld [vmem:[%s756_s24 + $0xc8] sm:$0xff]  ;;  %v242_v34 = vpack.c.bf16 %v219_v29, %v218_v28  ;;  %v220_v40 = vld [vmem:[%s756_s24 + $0x90] sm:$0xff]  ;;  %v221_v41 = vld [vmem:[%s756_s24 + $0x98] sm:$0xff]  ;;  %v239_v45 = vpack.c.bf16 %v213_v39, %v212_v38 }
  0x16   : > { %v246_v35 = vpack.c.bf16 %v227_v31, %v226_v30  ;;  %v228_v42 = vld [vmem:[%s756_s24 + $0xd0] sm:$0xff]  ;;  %v229_v43 = vld [vmem:[%s756_s24 + $0xd8] sm:$0xff]  ;;  %v243_v46 = vpack.c.bf16 %v221_v41, %v220_v40  ;;  %v206_v48 = vld [vmem:[%s756_s24 + $0x20] sm:$0xff] }
  0x17   : > { %276 = vmatpush.bf16.msra.mxu0 %v271_v8  ;;  %635 = vmatpush.bf16.msra.mxu1 %v271_v8  ;;  %v247_v47 = vpack.c.bf16 %v229_v43, %v228_v42  ;;  %v207_v49 = vld [vmem:[%s756_s24 + $0x28] sm:$0xff]  ;;  %v214_v50 = vld [vmem:[%s756_s24 + $0x60] sm:$0xff]  ;;  %v208_v60 = vld [vmem:[%s756_s24 + $0x30] sm:$0xff] }
  0x18   : > { %636 = vmatpush.bf16.msra.mxu2 %v271_v8  ;;  %637 = vmatpush.bf16.msra.mxu3 %v271_v8  ;;  %v215_v51 = vld [vmem:[%s756_s24 + $0x68] sm:$0xff]  ;;  %v222_v52 = vld [vmem:[%s756_s24 + $0xa0] sm:$0xff]  ;;  %v236_v56 = vpack.c.bf16 %v207_v49, %v206_v48  ;;  %v209_v61 = vld [vmem:[%s756_s24 + $0x38] sm:$0xff]  ;;  %v796_v8 = vstv %s363_s29 }
  0x19   : > { %v223_v53 = vld [vmem:[%s756_s24 + $0xa8] sm:$0xff]  ;;  %v230_v54 = vld [vmem:[%s756_s24 + $0xe0] sm:$0xff]  ;;  %v240_v57 = vpack.c.bf16 %v215_v51, %v214_v50  ;;  %v216_v62 = vld [vmem:[%s756_s24 + $0x70] sm:$0xff]  ;;  %v237_v4 = vpack.c.bf16 %v209_v61, %v208_v60 }
  0x1a   : > { %v231_v55 = vld [vmem:[%s756_s24 + $0xe8] sm:$0xff]  ;;  %v244_v58 = vpack.c.bf16 %v223_v53, %v222_v52  ;;  %v217_v63 = vld [vmem:[%s756_s24 + $0x78] sm:$0xff]  ;;  %v224_v0 = vld [vmem:[%s756_s24 + $0xb0] sm:$0xff] }
  0x1b   : > { %277 = vmatpush.bf16.msra.mxu0 %v270_v11  ;;  %638 = vmatpush.bf16.msra.mxu1 %v270_v11  ;;  %v248_v59 = vpack.c.bf16 %v231_v55, %v230_v54  ;;  %v225_v1 = vld [vmem:[%s756_s24 + $0xb8] sm:$0xff]  ;;  %v232_v2 = vld [vmem:[%s756_s24 + $0xf0] sm:$0xff]  ;;  %v241_v5 = vpack.c.bf16 %v217_v63, %v216_v62  ;;  %v801_v9 = vld [vmem:[%s944_s3] ss:$0 sm:$0xff] }
  0x1c   : > { %639 = vmatpush.bf16.msra.mxu2 %v270_v11  ;;  %640 = vmatpush.bf16.msra.mxu3 %v270_v11  ;;  %v233_v3 = vld [vmem:[%s756_s24 + $0xf8] sm:$0xff]  ;;  %v245_v6 = vpack.c.bf16 %v225_v1, %v224_v0 }
  0x1d   : > { %v249_v7 = vpack.c.bf16 %v233_v3, %v232_v2 }
  0x1f   : > { %278 = vmatpush.bf16.msra.mxu0 %v269_v14  ;;  %641 = vmatpush.bf16.msra.mxu1 %v269_v14 }
  0x20   : > { %642 = vmatpush.bf16.msra.mxu2 %v269_v14  ;;  %643 = vmatpush.bf16.msra.mxu3 %v269_v14 }
  0x23   : > { %279 = vmatpush.bf16.msra.mxu0 %v268_v17  ;;  %644 = vmatpush.bf16.msra.mxu1 %v268_v17 }
  0x24   : > { %645 = vmatpush.bf16.msra.mxu2 %v268_v17  ;;  %646 = vmatpush.bf16.msra.mxu3 %v268_v17 }
  0x27   : > { %280 = vmatpush.bf16.msra.mxu0 %v267_v20  ;;  %647 = vmatpush.bf16.msra.mxu1 %v267_v20 }
  0x28   : > { %648 = vmatpush.bf16.msra.mxu2 %v267_v20  ;;  %649 = vmatpush.bf16.msra.mxu3 %v267_v20 }
  0x2b   : > { %281 = vmatpush.bf16.msra.mxu0 %v266_v25  ;;  %650 = vmatpush.bf16.msra.mxu1 %v266_v25 }
  0x2c   : > { %651 = vmatpush.bf16.msra.mxu2 %v266_v25  ;;  %652 = vmatpush.bf16.msra.mxu3 %v266_v25 }
  0x2e   : > { %282 = vmatmul.bf16.vlgmr.msra.gmra.mxu0 %v234_v32  ;;  %302 = vmatmul.bf16.vlgmr.msra.gmra.mxu1 %v238_v33 }
  0x2f   : > { %322 = vmatmul.bf16.vlgmr.msra.gmra.mxu2 %v242_v34  ;;  %342 = vmatmul.bf16.vlgmr.msra.gmra.mxu3 %v246_v35 }
  0x3e   : > { %287 = vmatmul.bf16.gmra.mxu0 %v235_v44  ;;  %307 = vmatmul.bf16.gmra.mxu1 %v239_v45 }
  0x3f   : > { %327 = vmatmul.bf16.gmra.mxu2 %v243_v46  ;;  %347 = vmatmul.bf16.gmra.mxu3 %v247_v47 }
  0x4e   : > { %292 = vmatmul.bf16.gmra.mxu0 %v236_v56  ;;  %312 = vmatmul.bf16.gmra.mxu1 %v240_v57 }
  0x4f   : > { %332 = vmatmul.bf16.gmra.mxu2 %v244_v58  ;;  %352 = vmatmul.bf16.gmra.mxu3 %v248_v59 }
  0x5e   : > { %297 = vmatmul.bf16.gmra.mxu0 %v237_v4  ;;  %317 = vmatmul.bf16.gmra.mxu1 %v241_v5 }
  0x5f   : > { %337 = vmatmul.bf16.gmra.mxu2 %v245_v6  ;;  %357 = vmatmul.bf16.gmra.mxu3 %v249_v7 }
  0xab   : > { %v283_v10 = vpop.f32.mrf.mxu0  ;;  %v303_v11 = vpop.f32.mrf.mxu1 }
  0xac   : > { %v365_v12 = vmul.f32 %v796_v8, %v283_v10  ;;  %v373_v13 = vmul.f32 %v796_v8, %v303_v11 }
  0xae   : > { %v401_v14 = vadd.f32 %v801_v9, %v365_v12  ;;  %v409_v15 = vadd.f32 %v801_v9, %v373_v13 }
  0xb0   : > { %vm433_vm1 = vcmp.ge.f32.partialorder %v401_v14, 0.0  ;;  %v465_v16 = vmul.f32 0.1, %v401_v14  ;;  %vm441_vm2 = vcmp.ge.f32.partialorder %v409_v15, 0.0  ;;  %v473_v17 = vmul.f32 0.1, %v409_v15 }
  0xb2   : > { %v497_v18 = vsel %vm433_vm1, %v401_v14, %v465_v16  ;;  %v505_v19 = vsel %vm441_vm2, %v409_v15, %v473_v17  ;;  %v323_v20 = vpop.f32.mrf.mxu2  ;;  %v343_v21 = vpop.f32.mrf.mxu3 }
  0xb3   : > { %530 = vst.msk [vmem:[%s812_s9] sm:$0xff] %vm529_vm0, %v497_v18  ;;  %v381_v22 = vmul.f32 %v796_v8, %v323_v20  ;;  %v389_v23 = vmul.f32 %v796_v8, %v343_v21  ;;  %v285_v24 = vpop.f32.mrf.mxu0  ;;  %v305_v25 = vpop.f32.mrf.mxu1 }
  0xb4   : > { %538 = vst.msk [vmem:[%s812_s9 + $0x40] sm:$0xff] %vm529_vm0, %v505_v19  ;;  %v366_v26 = vmul.f32 %v796_v8, %v285_v24  ;;  %v374_v27 = vmul.f32 %v796_v8, %v305_v25 }
  0xb5   : > { %v417_v28 = vadd.f32 %v801_v9, %v381_v22  ;;  %v425_v29 = vadd.f32 %v801_v9, %v389_v23 }
  0xb6   : > { %v402_v30 = vadd.f32 %v801_v9, %v366_v26  ;;  %v410_v31 = vadd.f32 %v801_v9, %v374_v27 }
  0xb7   : > { %vm449_vm3 = vcmp.ge.f32.partialorder %v417_v28, 0.0  ;;  %v481_v32 = vmul.f32 0.1, %v417_v28  ;;  %vm457_vm4 = vcmp.ge.f32.partialorder %v425_v29, 0.0  ;;  %v489_v33 = vmul.f32 0.1, %v425_v29 }
  0xb8   : > { %vm434_vm5 = vcmp.ge.f32.partialorder %v402_v30, 0.0  ;;  %v466_v34 = vmul.f32 0.1, %v402_v30  ;;  %vm442_vm6 = vcmp.ge.f32.partialorder %v410_v31, 0.0  ;;  %v474_v35 = vmul.f32 0.1, %v410_v31 }
  0xb9   : > { %v513_v36 = vsel %vm449_vm3, %v417_v28, %v481_v32  ;;  %v521_v37 = vsel %vm457_vm4, %v425_v29, %v489_v33 }
  0xba   : > { %546 = vst.msk [vmem:[%s812_s9 + $0x80] sm:$0xff] %vm529_vm0, %v513_v36  ;;  %v498_v38 = vsel %vm434_vm5, %v402_v30, %v466_v34  ;;  %v506_v39 = vsel %vm442_vm6, %v410_v31, %v474_v35  ;;  %v325_v40 = vpop.f32.mrf.mxu2  ;;  %v345_v41 = vpop.f32.mrf.mxu3 }
  0xbb   : > { %554 = vst.msk [vmem:[%s812_s9 + $0xc0] sm:$0xff] %vm529_vm0, %v521_v37  ;;  %v382_v42 = vmul.f32 %v796_v8, %v325_v40  ;;  %v390_v43 = vmul.f32 %v796_v8, %v345_v41  ;;  %v288_v44 = vpop.f32.mrf.mxu0  ;;  %v308_v45 = vpop.f32.mrf.mxu1 }
  0xbc   : > { %531 = vst.msk [vmem:[%s812_s9 + $0x8] sm:$0xff] %vm529_vm0, %v498_v38  ;;  %v367_v46 = vmul.f32 %v796_v8, %v288_v44  ;;  %v375_v47 = vmul.f32 %v796_v8, %v308_v45 }
  0xbd   : > { %539 = vst.msk [vmem:[%s812_s9 + $0x48] sm:$0xff] %vm529_vm0, %v506_v39  ;;  %v418_v48 = vadd.f32 %v801_v9, %v382_v42  ;;  %v426_v49 = vadd.f32 %v801_v9, %v390_v43 }
  0xbe   : > { %v403_v50 = vadd.f32 %v801_v9, %v367_v46  ;;  %v411_v51 = vadd.f32 %v801_v9, %v375_v47 }
  0xbf   : > { %vm450_vm7 = vcmp.ge.f32.partialorder %v418_v48, 0.0  ;;  %v482_v52 = vmul.f32 0.1, %v418_v48  ;;  %vm458_vm8 = vcmp.ge.f32.partialorder %v426_v49, 0.0  ;;  %v490_v53 = vmul.f32 0.1, %v426_v49 }
  0xc0   : > { %vm435_vm9 = vcmp.ge.f32.partialorder %v403_v50, 0.0  ;;  %v467_v54 = vmul.f32 0.1, %v403_v50  ;;  %vm443_vm10 = vcmp.ge.f32.partialorder %v411_v51, 0.0  ;;  %v475_v55 = vmul.f32 0.1, %v411_v51 }
  0xc1   : > { %v514_v56 = vsel %vm450_vm7, %v418_v48, %v482_v52  ;;  %v522_v57 = vsel %vm458_vm8, %v426_v49, %v490_v53 }
  0xc2   : > { %547 = vst.msk [vmem:[%s812_s9 + $0x88] sm:$0xff] %vm529_vm0, %v514_v56  ;;  %v499_v58 = vsel %vm435_vm9, %v403_v50, %v467_v54  ;;  %v507_v59 = vsel %vm443_vm10, %v411_v51, %v475_v55  ;;  %v328_v60 = vpop.f32.mrf.mxu2  ;;  %v348_v61 = vpop.f32.mrf.mxu3 }
  0xc3   : > { %555 = vst.msk [vmem:[%s812_s9 + $0xc8] sm:$0xff] %vm529_vm0, %v522_v57  ;;  %v383_v62 = vmul.f32 %v796_v8, %v328_v60  ;;  %v391_v63 = vmul.f32 %v796_v8, %v348_v61  ;;  %v290_v0 = vpop.f32.mrf.mxu0  ;;  %v310_v1 = vpop.f32.mrf.mxu1 }
  0xc4   : > { %532 = vst.msk [vmem:[%s812_s9 + $0x10] sm:$0xff] %vm529_vm0, %v499_v58  ;;  %v368_v2 = vmul.f32 %v796_v8, %v290_v0  ;;  %v376_v3 = vmul.f32 %v796_v8, %v310_v1 }
  0xc5   : > { %540 = vst.msk [vmem:[%s812_s9 + $0x50] sm:$0xff] %vm529_vm0, %v507_v59  ;;  %v419_v4 = vadd.f32 %v801_v9, %v383_v62  ;;  %v427_v5 = vadd.f32 %v801_v9, %v391_v63 }
  0xc6   : > { %v404_v6 = vadd.f32 %v801_v9, %v368_v2  ;;  %v412_v7 = vadd.f32 %v801_v9, %v376_v3 }
  0xc7   : > { %vm451_vm11 = vcmp.ge.f32.partialorder %v419_v4, 0.0  ;;  %v483_v10 = vmul.f32 0.1, %v419_v4  ;;  %vm459_vm12 = vcmp.ge.f32.partialorder %v427_v5, 0.0  ;;  %v491_v11 = vmul.f32 0.1, %v427_v5 }
  0xc8   : > { %vm436_vm13 = vcmp.ge.f32.partialorder %v404_v6, 0.0  ;;  %v468_v12 = vmul.f32 0.1, %v404_v6  ;;  %vm444_vm14 = vcmp.ge.f32.partialorder %v412_v7, 0.0  ;;  %v476_v13 = vmul.f32 0.1, %v412_v7 }
  0xc9   : > { %v515_v14 = vsel %vm451_vm11, %v419_v4, %v483_v10  ;;  %v523_v15 = vsel %vm459_vm12, %v427_v5, %v491_v11 }
  0xca   : > { %548 = vst.msk [vmem:[%s812_s9 + $0x90] sm:$0xff] %vm529_vm0, %v515_v14  ;;  %v500_v16 = vsel %vm436_vm13, %v404_v6, %v468_v12  ;;  %v508_v17 = vsel %vm444_vm14, %v412_v7, %v476_v13  ;;  %v330_v18 = vpop.f32.mrf.mxu2  ;;  %v350_v19 = vpop.f32.mrf.mxu3 }
  0xcb   : > { %556 = vst.msk [vmem:[%s812_s9 + $0xd0] sm:$0xff] %vm529_vm0, %v523_v15  ;;  %v384_v20 = vmul.f32 %v796_v8, %v330_v18  ;;  %v392_v21 = vmul.f32 %v796_v8, %v350_v19  ;;  %v293_v22 = vpop.f32.mrf.mxu0  ;;  %v313_v23 = vpop.f32.mrf.mxu1 }
  0xcc   : > { %533 = vst.msk [vmem:[%s812_s9 + $0x18] sm:$0xff] %vm529_vm0, %v500_v16  ;;  %v369_v24 = vmul.f32 %v796_v8, %v293_v22  ;;  %v377_v25 = vmul.f32 %v796_v8, %v313_v23 }
  0xcd   : > { %541 = vst.msk [vmem:[%s812_s9 + $0x58] sm:$0xff] %vm529_vm0, %v508_v17  ;;  %v420_v26 = vadd.f32 %v801_v9, %v384_v20  ;;  %v428_v27 = vadd.f32 %v801_v9, %v392_v21 }
  0xce   : > { %v405_v28 = vadd.f32 %v801_v9, %v369_v24  ;;  %v413_v29 = vadd.f32 %v801_v9, %v377_v25 }
  0xcf   : > { %vm452_vm15 = vcmp.ge.f32.partialorder %v420_v26, 0.0  ;;  %v484_v30 = vmul.f32 0.1, %v420_v26  ;;  %vm460_vm1 = vcmp.ge.f32.partialorder %v428_v27, 0.0  ;;  %v492_v31 = vmul.f32 0.1, %v428_v27 }
  0xd0   : > { %vm437_vm2 = vcmp.ge.f32.partialorder %v405_v28, 0.0  ;;  %v469_v32 = vmul.f32 0.1, %v405_v28  ;;  %vm445_vm3 = vcmp.ge.f32.partialorder %v413_v29, 0.0  ;;  %v477_v33 = vmul.f32 0.1, %v413_v29 }
  0xd1   : > { %v516_v34 = vsel %vm452_vm15, %v420_v26, %v484_v30  ;;  %v524_v35 = vsel %vm460_vm1, %v428_v27, %v492_v31 }
  0xd2   : > { %549 = vst.msk [vmem:[%s812_s9 + $0x98] sm:$0xff] %vm529_vm0, %v516_v34  ;;  %v501_v36 = vsel %vm437_vm2, %v405_v28, %v469_v32  ;;  %v509_v37 = vsel %vm445_vm3, %v413_v29, %v477_v33  ;;  %v333_v38 = vpop.f32.mrf.mxu2  ;;  %v353_v39 = vpop.f32.mrf.mxu3 }
  0xd3   : > { %557 = vst.msk [vmem:[%s812_s9 + $0xd8] sm:$0xff] %vm529_vm0, %v524_v35  ;;  %v385_v40 = vmul.f32 %v796_v8, %v333_v38  ;;  %v393_v41 = vmul.f32 %v796_v8, %v353_v39  ;;  %v295_v42 = vpop.f32.mrf.mxu0  ;;  %v315_v43 = vpop.f32.mrf.mxu1 }
  0xd4   : > { %534 = vst.msk [vmem:[%s812_s9 + $0x20] sm:$0xff] %vm529_vm0, %v501_v36  ;;  %v370_v44 = vmul.f32 %v796_v8, %v295_v42  ;;  %v378_v45 = vmul.f32 %v796_v8, %v315_v43 }
  0xd5   : > { %542 = vst.msk [vmem:[%s812_s9 + $0x60] sm:$0xff] %vm529_vm0, %v509_v37  ;;  %v421_v46 = vadd.f32 %v801_v9, %v385_v40  ;;  %v429_v47 = vadd.f32 %v801_v9, %v393_v41 }
  0xd6   : > { %v406_v48 = vadd.f32 %v801_v9, %v370_v44  ;;  %v414_v49 = vadd.f32 %v801_v9, %v378_v45 }
  0xd7   : > { %vm453_vm4 = vcmp.ge.f32.partialorder %v421_v46, 0.0  ;;  %v485_v50 = vmul.f32 0.1, %v421_v46  ;;  %vm461_vm5 = vcmp.ge.f32.partialorder %v429_v47, 0.0  ;;  %v493_v51 = vmul.f32 0.1, %v429_v47 }
  0xd8   : > { %vm438_vm6 = vcmp.ge.f32.partialorder %v406_v48, 0.0  ;;  %v470_v52 = vmul.f32 0.1, %v406_v48  ;;  %vm446_vm7 = vcmp.ge.f32.partialorder %v414_v49, 0.0  ;;  %v478_v53 = vmul.f32 0.1, %v414_v49 }
  0xd9   : > { %v517_v54 = vsel %vm453_vm4, %v421_v46, %v485_v50  ;;  %v525_v55 = vsel %vm461_vm5, %v429_v47, %v493_v51 }
  0xda   : > { %550 = vst.msk [vmem:[%s812_s9 + $0xa0] sm:$0xff] %vm529_vm0, %v517_v54  ;;  %v502_v56 = vsel %vm438_vm6, %v406_v48, %v470_v52  ;;  %v510_v57 = vsel %vm446_vm7, %v414_v49, %v478_v53  ;;  %v335_v58 = vpop.f32.mrf.mxu2  ;;  %v355_v59 = vpop.f32.mrf.mxu3 }
  0xdb   : > { %558 = vst.msk [vmem:[%s812_s9 + $0xe0] sm:$0xff] %vm529_vm0, %v525_v55  ;;  %v386_v60 = vmul.f32 %v796_v8, %v335_v58  ;;  %v394_v61 = vmul.f32 %v796_v8, %v355_v59  ;;  %v298_v62 = vpop.f32.mrf.mxu0  ;;  %v318_v63 = vpop.f32.mrf.mxu1 }
  0xdc   : > { %535 = vst.msk [vmem:[%s812_s9 + $0x28] sm:$0xff] %vm529_vm0, %v502_v56  ;;  %v371_v0 = vmul.f32 %v796_v8, %v298_v62  ;;  %v379_v1 = vmul.f32 %v796_v8, %v318_v63 }
  0xdd   : > { %543 = vst.msk [vmem:[%s812_s9 + $0x68] sm:$0xff] %vm529_vm0, %v510_v57  ;;  %v422_v2 = vadd.f32 %v801_v9, %v386_v60  ;;  %v430_v3 = vadd.f32 %v801_v9, %v394_v61 }
  0xde   : > { %v407_v4 = vadd.f32 %v801_v9, %v371_v0  ;;  %v415_v5 = vadd.f32 %v801_v9, %v379_v1 }
  0xdf   : > { %vm454_vm8 = vcmp.ge.f32.partialorder %v422_v2, 0.0  ;;  %v486_v6 = vmul.f32 0.1, %v422_v2  ;;  %vm462_vm9 = vcmp.ge.f32.partialorder %v430_v3, 0.0  ;;  %v494_v7 = vmul.f32 0.1, %v430_v3 }
  0xe0   : > { %vm439_vm10 = vcmp.ge.f32.partialorder %v407_v4, 0.0  ;;  %v471_v10 = vmul.f32 0.1, %v407_v4  ;;  %vm447_vm11 = vcmp.ge.f32.partialorder %v415_v5, 0.0  ;;  %v479_v11 = vmul.f32 0.1, %v415_v5 }
  0xe1   : > { %v518_v12 = vsel %vm454_vm8, %v422_v2, %v486_v6  ;;  %v526_v13 = vsel %vm462_vm9, %v430_v3, %v494_v7 }
  0xe2   : > { %551 = vst.msk [vmem:[%s812_s9 + $0xa8] sm:$0xff] %vm529_vm0, %v518_v12  ;;  %v503_v14 = vsel %vm439_vm10, %v407_v4, %v471_v10  ;;  %v511_v15 = vsel %vm447_vm11, %v415_v5, %v479_v11  ;;  %v338_v16 = vpop.f32.mrf.mxu2  ;;  %v358_v17 = vpop.f32.mrf.mxu3 }
  0xe3   : > { %559 = vst.msk [vmem:[%s812_s9 + $0xe8] sm:$0xff] %vm529_vm0, %v526_v13  ;;  %v387_v18 = vmul.f32 %v796_v8, %v338_v16  ;;  %v395_v19 = vmul.f32 %v796_v8, %v358_v17  ;;  %v300_v20 = vpop.f32.mrf.mxu0  ;;  %v320_v21 = vpop.f32.mrf.mxu1 }
  0xe4   : > { %536 = vst.msk [vmem:[%s812_s9 + $0x30] sm:$0xff] %vm529_vm0, %v503_v14  ;;  %v372_v22 = vmul.f32 %v796_v8, %v300_v20  ;;  %v380_v23 = vmul.f32 %v796_v8, %v320_v21 }
  0xe5   : > { %544 = vst.msk [vmem:[%s812_s9 + $0x70] sm:$0xff] %vm529_vm0, %v511_v15  ;;  %v423_v24 = vadd.f32 %v801_v9, %v387_v18  ;;  %v431_v25 = vadd.f32 %v801_v9, %v395_v19 }
  0xe6   : > { %v408_v26 = vadd.f32 %v801_v9, %v372_v22  ;;  %v416_v27 = vadd.f32 %v801_v9, %v380_v23 }
  0xe7   : > { %vm455_vm12 = vcmp.ge.f32.partialorder %v423_v24, 0.0  ;;  %v487_v28 = vmul.f32 0.1, %v423_v24  ;;  %vm463_vm13 = vcmp.ge.f32.partialorder %v431_v25, 0.0  ;;  %v495_v29 = vmul.f32 0.1, %v431_v25 }
  0xe8   : > { %vm440_vm14 = vcmp.ge.f32.partialorder %v408_v26, 0.0  ;;  %v472_v30 = vmul.f32 0.1, %v408_v26  ;;  %vm448_vm15 = vcmp.ge.f32.partialorder %v416_v27, 0.0  ;;  %v480_v31 = vmul.f32 0.1, %v416_v27 }
  0xe9   : > { %v519_v32 = vsel %vm455_vm12, %v423_v24, %v487_v28  ;;  %v527_v33 = vsel %vm463_vm13, %v431_v25, %v495_v29 }
  0xea   : > { %552 = vst.msk [vmem:[%s812_s9 + $0xb0] sm:$0xff] %vm529_vm0, %v519_v32  ;;  %v504_v34 = vsel %vm440_vm14, %v408_v26, %v472_v30  ;;  %v512_v35 = vsel %vm448_vm15, %v416_v27, %v480_v31  ;;  %v340_v36 = vpop.f32.mrf.mxu2  ;;  %v360_v37 = vpop.f32.mrf.mxu3 }
  0xeb   : > { %560 = vst.msk [vmem:[%s812_s9 + $0xf0] sm:$0xff] %vm529_vm0, %v527_v33  ;;  %v388_v38 = vmul.f32 %v796_v8, %v340_v36  ;;  %v396_v39 = vmul.f32 %v796_v8, %v360_v37 }
  0xec   : > { %537 = vst.msk [vmem:[%s812_s9 + $0x38] sm:$0xff] %vm529_vm0, %v504_v34 }
  0xed   : > { %545 = vst.msk [vmem:[%s812_s9 + $0x78] sm:$0xff] %vm529_vm0, %v512_v35  ;;  %v424_v40 = vadd.f32 %v801_v9, %v388_v38  ;;  %v432_v41 = vadd.f32 %v801_v9, %v396_v39 }
  0xef   : > { %vm456_vm1 = vcmp.ge.f32.partialorder %v424_v40, 0.0  ;;  %v488_v42 = vmul.f32 0.1, %v424_v40  ;;  %vm464_vm2 = vcmp.ge.f32.partialorder %v432_v41, 0.0  ;;  %v496_v43 = vmul.f32 0.1, %v432_v41 }
  0xf1   : > { %v520_v44 = vsel %vm456_vm1, %v424_v40, %v488_v42  ;;  %v528_v45 = vsel %vm464_vm2, %v432_v41, %v496_v43 }
  0xf2   : > { %553 = vst.msk [vmem:[%s812_s9 + $0xb8] sm:$0xff] %vm529_vm0, %v520_v44 }
  0xf3   : > { %561 = vst.msk [vmem:[%s812_s9 + $0xf8] sm:$0xff] %vm529_vm0, %v528_v45 }
  0xf4 PF: > { %s15_s17 = sadd.s32 1, %s668_s17  }
  0xf5   : > { %p12_p4 = scmp.ge.s32.totalorder %s15_s17, 4  }
  0xf7   :  { %14 = sbr.rel (!%p12_p4) target bundleno = 2 (0x2), region = 66 }

// kernel: discriminator_forward.7
= control target key start
LH: loop header
LB: loop body
LE: loop exit
PB: predicated region body
PF: predicated region fallthrough
CT: control target
= control target key end

     0   :  { %s520_s17 = smov 0   ;;  %s698_s0 = inlined_call_operand.<no memory space> [shape: f32[1], index: 0, kind: input, shape index: {}]   ;;  %s699_s1 = inlined_call_operand.vmem [shape: f32[128,256], index: 1, kind: input, shape index: {}]   ;;  %s700_s2 = inlined_call_operand.vmem [shape: f32[256,32], index: 2, kind: input, shape index: {}]   ;;  %s701_s3 = inlined_call_operand.vmem [shape: f32[1,32], index: 3, kind: input, shape index: {}]   ;;  %s702_s4 = inlined_call_operand.vmem [shape: f32[128,32], index: 4, kind: output, shape index: {}]  }
   0x1   :  { %9 = sst [smem:[#allocation2]] %s698_s0 }
   0x2 LB: > { %s446_s18 = sadd.s32 4294967295, %s490_s17   ;;  %p450_p0 = scmp.ge.s32.totalorder %s490_s17, 1  ;;  %s490_s17 = sphi %s520_s17, %s15_s17  }
   0x3   : > { %p165_p1 = scmp.lt.s32.totalorder %s490_s17, 3 }
   0x5   : > { %p166_p2 = pnand %p450_p0, %p165_p1 }
   0x6   : > { %s451_s25 = sshll.u32 (!%p166_p2), %s446_s18, 3  ;;  %s335_s10 = sld [smem:[#allocation2]] (!%p166_p2) }
   0x7   : > { %169 = sbr.rel (%p166_p2) target bundleno = 213 (0xd5), region = 36  ;;  %p193_p3 = scmp.lt.s32.totalorder (!%p166_p2), %s451_s25, 15 }
   0xc   : > { %v243_v0 = vld [vmem:[%s700_s2 + $0x70] sm:$0xff]  ;;  %v244_v1 = vld [vmem:[%s700_s2 + $0x78] sm:$0xff]  ;;  %v241_v5 = vld [vmem:[%s700_s2 + $0x60] sm:$0xff]  ;;  %s704_s25 = smov (!%p193_p3, %s451_s25), 15  ;;  %vm381_vm1 = vcmask 261120  }
   0xd   : > { %v259_v2 = vld [vmem:[%s700_s2 + $0xf0] sm:$0xff]  ;;  %v268_v3 = vpack.c.bf16 %v244_v1, %v243_v0  ;;  %v260_v4 = vld [vmem:[%s700_s2 + $0xf8] sm:$0xff]  ;;  %v242_v6 = vld [vmem:[%s700_s2 + $0x68] sm:$0xff]  ;;  %s458_s0 = sshll.u32 %s704_s25, 4  ;;  %s455_s13 = sshll.u32 %s704_s25, 3 }
   0xe   : > { %v276_v7 = vpack.c.bf16 %v260_v4, %v259_v2  ;;  %v257_v8 = vld [vmem:[%s700_s2 + $0xe0] sm:$0xff]  ;;  %v258_v9 = vld [vmem:[%s700_s2 + $0xe8] sm:$0xff]  ;;  %v267_v10 = vpack.c.bf16 %v242_v6, %v241_v5  ;;  %v239_v12 = vld [vmem:[%s700_s2 + $0x50] sm:$0xff]  ;;  %s620_s28 = scalar_lea.vmem %s699_s1, %s458_s0  ;;  %s663_s16 = scalar_lea.vmem %s702_s4, %s455_s13 }
   0xf   : > { %277 = vmatpush.bf16.msra.mxu0 %v268_v3  ;;  %459 = vmatpush.bf16.msra.mxu2 %v268_v3  ;;  %v275_v11 = vpack.c.bf16 %v258_v9, %v257_v8  ;;  %v240_v13 = vld [vmem:[%s700_s2 + $0x58] sm:$0xff]  ;;  %v255_v14 = vld [vmem:[%s700_s2 + $0xd0] sm:$0xff]  ;;  %v237_v18 = vld [vmem:[%s700_s2 + $0x40] sm:$0xff] }
  0x10   : > { %306 = vmatpush.bf16.msra.mxu1 %v276_v7  ;;  %467 = vmatpush.bf16.msra.mxu3 %v276_v7  ;;  %v256_v15 = vld [vmem:[%s700_s2 + $0xd8] sm:$0xff]  ;;  %v266_v16 = vpack.c.bf16 %v240_v13, %v239_v12  ;;  %v238_v19 = vld [vmem:[%s700_s2 + $0x48] sm:$0xff]  ;;  %v253_v20 = vld [vmem:[%s700_s2 + $0xc0] sm:$0xff] }
  0x11   : > { %v274_v17 = vpack.c.bf16 %v256_v15, %v255_v14  ;;  %v254_v21 = vld [vmem:[%s700_s2 + $0xc8] sm:$0xff]  ;;  %v265_v22 = vpack.c.bf16 %v238_v19, %v237_v18  ;;  %v235_v24 = vld [vmem:[%s700_s2 + $0x30] sm:$0xff]  ;;  %v236_v25 = vld [vmem:[%s700_s2 + $0x38] sm:$0xff] }
  0x12   : > { %v273_v23 = vpack.c.bf16 %v254_v21, %v253_v20  ;;  %v251_v26 = vld [vmem:[%s700_s2 + $0xb0] sm:$0xff]  ;;  %v252_v27 = vld [vmem:[%s700_s2 + $0xb8] sm:$0xff]  ;;  %v264_v28 = vpack.c.bf16 %v236_v25, %v235_v24  ;;  %v233_v30 = vld [vmem:[%s700_s2 + $0x20] sm:$0xff] }
  0x13   : > { %278 = vmatpush.bf16.msra.mxu0 %v267_v10  ;;  %460 = vmatpush.bf16.msra.mxu2 %v267_v10  ;;  %v272_v29 = vpack.c.bf16 %v252_v27, %v251_v26  ;;  %v234_v31 = vld [vmem:[%s700_s2 + $0x28] sm:$0xff]  ;;  %v249_v32 = vld [vmem:[%s700_s2 + $0xa0] sm:$0xff]  ;;  %v231_v36 = vld [vmem:[%s700_s2 + $0x10] sm:$0xff]  ;;  %v650_v10 = vstv %s335_s10 }
  0x14   : > { %307 = vmatpush.bf16.msra.mxu1 %v275_v11  ;;  %468 = vmatpush.bf16.msra.mxu3 %v275_v11  ;;  %v250_v33 = vld [vmem:[%s700_s2 + $0xa8] sm:$0xff]  ;;  %v263_v34 = vpack.c.bf16 %v234_v31, %v233_v30  ;;  %v232_v37 = vld [vmem:[%s700_s2 + $0x18] sm:$0xff]  ;;  %v247_v38 = vld [vmem:[%s700_s2 + $0x90] sm:$0xff] }
  0x15   : > { %v271_v35 = vpack.c.bf16 %v250_v33, %v249_v32  ;;  %v248_v39 = vld [vmem:[%s700_s2 + $0x98] sm:$0xff]  ;;  %v262_v40 = vpack.c.bf16 %v232_v37, %v231_v36  ;;  %v229_v42 = vld [vmem:[%s700_s2] sm:$0xff]  ;;  %v230_v43 = vld [vmem:[%s700_s2 + $0x8] sm:$0xff] }
  0x16   : > { %v270_v41 = vpack.c.bf16 %v248_v39, %v247_v38  ;;  %v245_v44 = vld [vmem:[%s700_s2 + $0x80] sm:$0xff]  ;;  %v246_v45 = vld [vmem:[%s700_s2 + $0x88] sm:$0xff]  ;;  %v207_v47 = vld [vmem:[%s620_s28 + $0x10] sm:$0xff]  ;;  %v261_v48 = vpack.c.bf16 %v230_v43, %v229_v42 }
  0x17   : > { %279 = vmatpush.bf16.msra.mxu0 %v266_v16  ;;  %461 = vmatpush.bf16.msra.mxu2 %v266_v16  ;;  %v205_v46 = vld [vmem:[%s620_s28] sm:$0xff]  ;;  %v215_v50 = vld [vmem:[%s620_s28 + $0x50] sm:$0xff]  ;;  %v206_v51 = vld [vmem:[%s620_s28 + $0x8] sm:$0xff]  ;;  %v269_v52 = vpack.c.bf16 %v246_v45, %v245_v44 }
  0x18   : > { %308 = vmatpush.bf16.msra.mxu1 %v274_v17  ;;  %469 = vmatpush.bf16.msra.mxu3 %v274_v17  ;;  %v213_v49 = vld [vmem:[%s620_s28 + $0x40] sm:$0xff]  ;;  %v208_v53 = vld [vmem:[%s620_s28 + $0x18] sm:$0xff]  ;;  %v214_v54 = vld [vmem:[%s620_s28 + $0x48] sm:$0xff]  ;;  %v221_v56 = vpack.c.bf16 %v207_v47, %v205_v46 }
  0x19   : > { %v216_v55 = vld [vmem:[%s620_s28 + $0x58] sm:$0xff]  ;;  %v225_v57 = vpack.c.bf16 %v215_v50, %v213_v49  ;;  %v222_v58 = vpack.c.bf16 %v208_v53, %v206_v51  ;;  %v209_v60 = vld [vmem:[%s620_s28 + $0x20] sm:$0xff]  ;;  %v211_v61 = vld [vmem:[%s620_s28 + $0x30] sm:$0xff] }
  0x1a   : > { %v226_v59 = vpack.c.bf16 %v216_v55, %v214_v54  ;;  %v217_v62 = vld [vmem:[%s620_s28 + $0x60] sm:$0xff]  ;;  %v219_v63 = vld [vmem:[%s620_s28 + $0x70] sm:$0xff]  ;;  %v210_v0 = vld [vmem:[%s620_s28 + $0x28] sm:$0xff]  ;;  %v223_v4 = vpack.c.bf16 %v211_v61, %v209_v60 }
  0x1b   : > { %280 = vmatpush.bf16.msra.mxu0 %v265_v22  ;;  %462 = vmatpush.bf16.msra.mxu2 %v265_v22  ;;  %v212_v1 = vld [vmem:[%s620_s28 + $0x38] sm:$0xff]  ;;  %v218_v2 = vld [vmem:[%s620_s28 + $0x68] sm:$0xff]  ;;  %v227_v5 = vpack.c.bf16 %v219_v63, %v217_v62  ;;  %v655_v12 = vld [vmem:[%s701_s3] ss:$0 sm:$0xff] }
  0x1c   : > { %309 = vmatpush.bf16.msra.mxu1 %v273_v23  ;;  %470 = vmatpush.bf16.msra.mxu3 %v273_v23  ;;  %v220_v3 = vld [vmem:[%s620_s28 + $0x78] sm:$0xff]  ;;  %v224_v6 = vpack.c.bf16 %v212_v1, %v210_v0 }
  0x1d   : > { %v228_v7 = vpack.c.bf16 %v220_v3, %v218_v2 }
  0x1f   : > { %281 = vmatpush.bf16.msra.mxu0 %v264_v28  ;;  %463 = vmatpush.bf16.msra.mxu2 %v264_v28 }
  0x20   : > { %310 = vmatpush.bf16.msra.mxu1 %v272_v29  ;;  %471 = vmatpush.bf16.msra.mxu3 %v272_v29 }
  0x23   : > { %282 = vmatpush.bf16.msra.mxu0 %v263_v34  ;;  %464 = vmatpush.bf16.msra.mxu2 %v263_v34 }
  0x24   : > { %311 = vmatpush.bf16.msra.mxu1 %v271_v35  ;;  %472 = vmatpush.bf16.msra.mxu3 %v271_v35 }
  0x27   : > { %283 = vmatpush.bf16.msra.mxu0 %v262_v40  ;;  %465 = vmatpush.bf16.msra.mxu2 %v262_v40 }
  0x28   : > { %312 = vmatpush.bf16.msra.mxu1 %v270_v41  ;;  %473 = vmatpush.bf16.msra.mxu3 %v270_v41 }
  0x2b   : > { %284 = vmatpush.bf16.msra.mxu0 %v261_v48  ;;  %466 = vmatpush.bf16.msra.mxu2 %v261_v48 }
  0x2c   : > { %313 = vmatpush.bf16.msra.mxu1 %v269_v52  ;;  %474 = vmatpush.bf16.msra.mxu3 %v269_v52 }
  0x2e   : > { %285 = vmatmul.bf16.vlgmr.msra.gmra.mxu0 %v221_v56  ;;  %295 = vmatmul.bf16.vlgmr.msra.gmra.mxu2 %v225_v57 }
  0x2f   : > { %314 = vmatmul.bf16.vlgmr.msra.gmra.mxu1 %v222_v58  ;;  %324 = vmatmul.bf16.vlgmr.msra.gmra.mxu3 %v226_v59 }
  0x3e   : > { %290 = vmatmul.bf16.gmra.mxu0 %v223_v4  ;;  %300 = vmatmul.bf16.gmra.mxu2 %v227_v5 }
  0x3f   : > { %319 = vmatmul.bf16.gmra.mxu1 %v224_v6  ;;  %329 = vmatmul.bf16.gmra.mxu3 %v228_v7 }
  0xab   : > { %v286_v8 = vpop.f32.mrf.mxu0 }
  0xac   : > { %v315_v9 = vpop.f32.mrf.mxu1 }
  0xad   : > { %v316_v11 = vadd.f32 %v315_v9, %v286_v8 }
  0xaf   : > { %v337_v13 = vmul.f32 %v650_v10, %v316_v11 }
  0xb1   : > { %v349_v14 = vadd.f32 %v655_v12, %v337_v13  ;;  %v296_v15 = vpop.f32.mrf.mxu2 }
  0xb2   : > { %v325_v16 = vpop.f32.mrf.mxu3 }
  0xb3   : > { %vm357_vm0 = vcmp.ge.f32.partialorder %v349_v14, 0.0  ;;  %v365_v17 = vmul.f32 0.1, %v349_v14  ;;  %v326_v18 = vadd.f32 %v325_v16, %v296_v15  ;;  %v288_v19 = vpop.f32.mrf.mxu0 }
  0xb4   : > { %v317_v20 = vpop.f32.mrf.mxu1 }
  0xb5   : > { %v373_v21 = vsel %vm357_vm0, %v349_v14, %v365_v17  ;;  %v341_v22 = vmul.f32 %v650_v10, %v326_v18  ;;  %v318_v23 = vadd.f32 %v317_v20, %v288_v19 }
  0xb6   : > { %382 = vst.msk [vmem:[%s663_s16] sm:$0xff] %vm381_vm1, %v373_v21 }
  0xb7   : > { %v353_v24 = vadd.f32 %v655_v12, %v341_v22  ;;  %v338_v25 = vmul.f32 %v650_v10, %v318_v23 }
  0xb9   : > { %vm361_vm2 = vcmp.ge.f32.partialorder %v353_v24, 0.0  ;;  %v369_v26 = vmul.f32 0.1, %v353_v24  ;;  %v350_v27 = vadd.f32 %v655_v12, %v338_v25  ;;  %v298_v28 = vpop.f32.mrf.mxu2 }
  0xba   : > { %v327_v29 = vpop.f32.mrf.mxu3 }
  0xbb   : > { %v377_v30 = vsel %vm361_vm2, %v353_v24, %v369_v26  ;;  %vm358_vm3 = vcmp.ge.f32.partialorder %v350_v27, 0.0  ;;  %v366_v31 = vmul.f32 0.1, %v350_v27  ;;  %v328_v32 = vadd.f32 %v327_v29, %v298_v28  ;;  %v291_v33 = vpop.f32.mrf.mxu0 }
  0xbc   : > { %386 = vst.msk [vmem:[%s663_s16 + $0x20] sm:$0xff] %vm381_vm1, %v377_v30  ;;  %v320_v34 = vpop.f32.mrf.mxu1 }
  0xbd   : > { %v374_v35 = vsel %vm358_vm3, %v350_v27, %v366_v31  ;;  %v342_v36 = vmul.f32 %v650_v10, %v328_v32  ;;  %v321_v37 = vadd.f32 %v320_v34, %v291_v33 }
  0xbe   : > { %383 = vst.msk [vmem:[%s663_s16 + $0x8] sm:$0xff] %vm381_vm1, %v374_v35 }
  0xbf   : > { %v354_v38 = vadd.f32 %v655_v12, %v342_v36  ;;  %v339_v39 = vmul.f32 %v650_v10, %v321_v37 }
  0xc1   : > { %vm362_vm4 = vcmp.ge.f32.partialorder %v354_v38, 0.0  ;;  %v370_v40 = vmul.f32 0.1, %v354_v38  ;;  %v351_v41 = vadd.f32 %v655_v12, %v339_v39  ;;  %v301_v42 = vpop.f32.mrf.mxu2 }
  0xc2   : > { %v330_v43 = vpop.f32.mrf.mxu3 }
  0xc3   : > { %v378_v44 = vsel %vm362_vm4, %v354_v38, %v370_v40  ;;  %vm359_vm5 = vcmp.ge.f32.partialorder %v351_v41, 0.0  ;;  %v367_v45 = vmul.f32 0.1, %v351_v41  ;;  %v331_v46 = vadd.f32 %v330_v43, %v301_v42  ;;  %v293_v47 = vpop.f32.mrf.mxu0 }
  0xc4   : > { %387 = vst.msk [vmem:[%s663_s16 + $0x28] sm:$0xff] %vm381_vm1, %v378_v44  ;;  %v322_v48 = vpop.f32.mrf.mxu1 }
  0xc5   : > { %v375_v49 = vsel %vm359_vm5, %v351_v41, %v367_v45  ;;  %v343_v50 = vmul.f32 %v650_v10, %v331_v46  ;;  %v323_v51 = vadd.f32 %v322_v48, %v293_v47 }
  0xc6   : > { %384 = vst.msk [vmem:[%s663_s16 + $0x10] sm:$0xff] %vm381_vm1, %v375_v49 }
  0xc7   : > { %v355_v52 = vadd.f32 %v655_v12, %v343_v50  ;;  %v340_v53 = vmul.f32 %v650_v10, %v323_v51 }
  0xc9   : > { %vm363_vm6 = vcmp.ge.f32.partialorder %v355_v52, 0.0  ;;  %v371_v54 = vmul.f32 0.1, %v355_v52  ;;  %v352_v55 = vadd.f32 %v655_v12, %v340_v53  ;;  %v303_v56 = vpop.f32.mrf.mxu2 }
  0xca   : > { %v332_v57 = vpop.f32.mrf.mxu3 }
  0xcb   : > { %v379_v58 = vsel %vm363_vm6, %v355_v52, %v371_v54  ;;  %vm360_vm7 = vcmp.ge.f32.partialorder %v352_v55, 0.0  ;;  %v368_v59 = vmul.f32 0.1, %v352_v55  ;;  %v333_v60 = vadd.f32 %v332_v57, %v303_v56 }
  0xcc   : > { %388 = vst.msk [vmem:[%s663_s16 + $0x30] sm:$0xff] %vm381_vm1, %v379_v58 }
  0xcd   : > { %v376_v61 = vsel %vm360_vm7, %v352_v55, %v368_v59  ;;  %v344_v62 = vmul.f32 %v650_v10, %v333_v60 }
  0xce   : > { %385 = vst.msk [vmem:[%s663_s16 + $0x18] sm:$0xff] %vm381_vm1, %v376_v61 }
  0xcf   : > { %v356_v63 = vadd.f32 %v655_v12, %v344_v62 }
  0xd1   : > { %vm364_vm8 = vcmp.ge.f32.partialorder %v356_v63, 0.0  ;;  %v372_v0 = vmul.f32 0.1, %v356_v63 }
  0xd3   : > { %v380_v1 = vsel %vm364_vm8, %v356_v63, %v372_v0 }
  0xd4   : > { %389 = vst.msk [vmem:[%s663_s16 + $0x38] sm:$0xff] %vm381_vm1, %v380_v1 }
  0xd5 PF: > { %s15_s17 = sadd.s32 1, %s490_s17  }
  0xd6   : > { %p12_p4 = scmp.ge.s32.totalorder %s15_s17, 4  }
  0xd8   :  { %14 = sbr.rel (!%p12_p4) target bundleno = 2 (0x2), region = 66 }

// kernel: discriminator_forward.8
= control target key start
LH: loop header
LB: loop body
LE: loop exit
PB: predicated region body
PF: predicated region fallthrough
CT: control target
= control target key end

     0   :  { %s502_s17 = smov 0   ;;  %s726_s0 = inlined_call_operand.<no memory space> [shape: f32[1], index: 0, kind: input, shape index: {}]   ;;  %s727_s1 = inlined_call_operand.vmem [shape: f32[32,512], index: 1, kind: input, shape index: {}]   ;;  %s728_s2 = inlined_call_operand.vmem [shape: f32[512,64], index: 2, kind: input, shape index: {}]   ;;  %s729_s3 = inlined_call_operand.vmem [shape: f32[1,64], index: 3, kind: input, shape index: {}]   ;;  %s730_s4 = inlined_call_operand.vmem [shape: f32[32,64], index: 4, kind: output, shape index: {}]  }
   0x1   :  { %9 = sst [smem:[#allocation2]] %s726_s0 }
   0x2 LB: > { %s444_s18 = sadd.s32 4294967295, %s472_s17   ;;  %p448_p0 = scmp.ge.s32.totalorder %s472_s17, 1  ;;  %s472_s17 = sphi %s502_s17, %s15_s17  }
   0x3   : > { %p165_p1 = scmp.lt.s32.totalorder %s472_s17, 3 }
   0x5   : > { %p166_p2 = pnand %p448_p0, %p165_p1 }
   0x6   : > { %s608_s6 = sshll.u32 (!%p166_p2), %s444_s18, 1  ;;  %s369_s25 = sld [smem:[#allocation2]] (!%p166_p2) }
   0x7   : > { %169 = sbr.rel (%p166_p2) target bundleno = 200 (0xc8), region = 36  ;;  %p193_p3 = scmp.lt.s32.totalorder (!%p166_p2), %s608_s6, 3 }
   0xc   : > { %v231_v0 = vld [vmem:[%s728_s2 + $0x70] sm:$0xff]  ;;  %v232_v1 = vld [vmem:[%s728_s2 + $0x78] sm:$0xff]  ;;  %v229_v11 = vld [vmem:[%s728_s2 + $0x60] sm:$0xff]  ;;  %s732_s6 = smov (!%p193_p3, %s608_s6), 3  ;;  %vm385_vm1 = vcmask 523264  }
   0xd   : > { %v247_v2 = vld [vmem:[%s728_s2 + $0xf0] sm:$0xff]  ;;  %v288_v3 = vpack.c.bf16 %v232_v1, %v231_v0  ;;  %v248_v4 = vld [vmem:[%s728_s2 + $0xf8] sm:$0xff]  ;;  %v230_v13 = vld [vmem:[%s728_s2 + $0x68] sm:$0xff]  ;;  %s456_s26 = sshll.u32 %s732_s6, 5  ;;  %s453_s28 = sshll.u32 %s732_s6, 3 }
   0xe   : > { %v263_v5 = vld [vmem:[%s728_s2 + $0x170] sm:$0xff]  ;;  %v264_v6 = vld [vmem:[%s728_s2 + $0x178] sm:$0xff]  ;;  %v296_v7 = vpack.c.bf16 %v248_v4, %v247_v2  ;;  %v245_v14 = vld [vmem:[%s728_s2 + $0xe0] sm:$0xff]  ;;  %v287_v16 = vpack.c.bf16 %v230_v13, %v229_v11  ;;  %s197_s13 = scalar_lea.vmem %s727_s1, %s456_s26  ;;  %s203_s5 = scalar_lea.vmem %s730_s4, %s453_s28 }
   0xf   : > { %v304_v8 = vpack.c.bf16 %v264_v6, %v263_v5  ;;  %v279_v9 = vld [vmem:[%s728_s2 + $0x1f0] sm:$0xff]  ;;  %v280_v10 = vld [vmem:[%s728_s2 + $0x1f8] sm:$0xff]  ;;  %313 = vmatpush.bf16.msra.mxu0 %v288_v3  ;;  %v246_v15 = vld [vmem:[%s728_s2 + $0xe8] sm:$0xff] }
  0x10   : > { %v312_v12 = vpack.c.bf16 %v280_v10, %v279_v9  ;;  %327 = vmatpush.bf16.msra.mxu1 %v296_v7  ;;  %v295_v17 = vpack.c.bf16 %v246_v15, %v245_v14  ;;  %v261_v18 = vld [vmem:[%s728_s2 + $0x160] sm:$0xff]  ;;  %v262_v19 = vld [vmem:[%s728_s2 + $0x168] sm:$0xff]  ;;  %v227_v23 = vld [vmem:[%s728_s2 + $0x50] sm:$0xff] }
  0x11   : > { %341 = vmatpush.bf16.msra.mxu2 %v304_v8  ;;  %v277_v20 = vld [vmem:[%s728_s2 + $0x1e0] sm:$0xff]  ;;  %v303_v21 = vpack.c.bf16 %v262_v19, %v261_v18  ;;  %v278_v22 = vld [vmem:[%s728_s2 + $0x1e8] sm:$0xff]  ;;  %v228_v24 = vld [vmem:[%s728_s2 + $0x58] sm:$0xff] }
  0x12   : > { %355 = vmatpush.bf16.msra.mxu3 %v312_v12  ;;  %v311_v25 = vpack.c.bf16 %v278_v22, %v277_v20  ;;  %v243_v26 = vld [vmem:[%s728_s2 + $0xd0] sm:$0xff]  ;;  %v244_v27 = vld [vmem:[%s728_s2 + $0xd8] sm:$0xff]  ;;  %v286_v29 = vpack.c.bf16 %v228_v24, %v227_v23  ;;  %v225_v35 = vld [vmem:[%s728_s2 + $0x40] sm:$0xff] }
  0x13   : > { %v259_v28 = vld [vmem:[%s728_s2 + $0x150] sm:$0xff]  ;;  %314 = vmatpush.bf16.msra.mxu0 %v287_v16  ;;  %v260_v30 = vld [vmem:[%s728_s2 + $0x158] sm:$0xff]  ;;  %v294_v33 = vpack.c.bf16 %v244_v27, %v243_v26  ;;  %v226_v36 = vld [vmem:[%s728_s2 + $0x48] sm:$0xff] }
  0x14   : > { %v275_v31 = vld [vmem:[%s728_s2 + $0x1d0] sm:$0xff]  ;;  %v276_v32 = vld [vmem:[%s728_s2 + $0x1d8] sm:$0xff]  ;;  %328 = vmatpush.bf16.msra.mxu1 %v295_v17  ;;  %v302_v34 = vpack.c.bf16 %v260_v30, %v259_v28  ;;  %v241_v37 = vld [vmem:[%s728_s2 + $0xc0] sm:$0xff]  ;;  %v285_v44 = vpack.c.bf16 %v226_v36, %v225_v35 }
  0x15   : > { %342 = vmatpush.bf16.msra.mxu2 %v303_v21  ;;  %v310_v38 = vpack.c.bf16 %v276_v32, %v275_v31  ;;  %v242_v39 = vld [vmem:[%s728_s2 + $0xc8] sm:$0xff]  ;;  %v257_v40 = vld [vmem:[%s728_s2 + $0x140] sm:$0xff]  ;;  %v223_v47 = vld [vmem:[%s728_s2 + $0x30] sm:$0xff] }
  0x16   : > { %356 = vmatpush.bf16.msra.mxu3 %v311_v25  ;;  %v258_v41 = vld [vmem:[%s728_s2 + $0x148] sm:$0xff]  ;;  %v273_v42 = vld [vmem:[%s728_s2 + $0x1c0] sm:$0xff]  ;;  %v293_v45 = vpack.c.bf16 %v242_v39, %v241_v37  ;;  %v224_v48 = vld [vmem:[%s728_s2 + $0x38] sm:$0xff] }
  0x17   : > { %v274_v43 = vld [vmem:[%s728_s2 + $0x1c8] sm:$0xff]  ;;  %315 = vmatpush.bf16.msra.mxu0 %v286_v29  ;;  %v301_v46 = vpack.c.bf16 %v258_v41, %v257_v40  ;;  %v239_v49 = vld [vmem:[%s728_s2 + $0xb0] sm:$0xff]  ;;  %v240_v51 = vld [vmem:[%s728_s2 + $0xb8] sm:$0xff]  ;;  %v284_v56 = vpack.c.bf16 %v224_v48, %v223_v47 }
  0x18   : > { %329 = vmatpush.bf16.msra.mxu1 %v294_v33  ;;  %v309_v50 = vpack.c.bf16 %v274_v43, %v273_v42  ;;  %v255_v52 = vld [vmem:[%s728_s2 + $0x130] sm:$0xff]  ;;  %v256_v53 = vld [vmem:[%s728_s2 + $0x138] sm:$0xff]  ;;  %v292_v57 = vpack.c.bf16 %v240_v51, %v239_v49  ;;  %v221_v59 = vld [vmem:[%s728_s2 + $0x20] sm:$0xff] }
  0x19   : > { %343 = vmatpush.bf16.msra.mxu2 %v302_v34  ;;  %v271_v54 = vld [vmem:[%s728_s2 + $0x1b0] sm:$0xff]  ;;  %v272_v55 = vld [vmem:[%s728_s2 + $0x1b8] sm:$0xff]  ;;  %v300_v58 = vpack.c.bf16 %v256_v53, %v255_v52  ;;  %v222_v60 = vld [vmem:[%s728_s2 + $0x28] sm:$0xff] }
  0x1a   : > { %357 = vmatpush.bf16.msra.mxu3 %v310_v38  ;;  %v237_v61 = vld [vmem:[%s728_s2 + $0xa0] sm:$0xff]  ;;  %v308_v62 = vpack.c.bf16 %v272_v55, %v271_v54  ;;  %v238_v63 = vld [vmem:[%s728_s2 + $0xa8] sm:$0xff]  ;;  %v283_v4 = vpack.c.bf16 %v222_v60, %v221_v59  ;;  %v219_v7 = vld [vmem:[%s728_s2 + $0x10] sm:$0xff] }
  0x1b   : > { %316 = vmatpush.bf16.msra.mxu0 %v285_v44  ;;  %v253_v0 = vld [vmem:[%s728_s2 + $0x120] sm:$0xff]  ;;  %v254_v1 = vld [vmem:[%s728_s2 + $0x128] sm:$0xff]  ;;  %v291_v5 = vpack.c.bf16 %v238_v63, %v237_v61  ;;  %v220_v8 = vld [vmem:[%s728_s2 + $0x18] sm:$0xff] }
  0x1c   : > { %330 = vmatpush.bf16.msra.mxu1 %v293_v45  ;;  %v269_v2 = vld [vmem:[%s728_s2 + $0x1a0] sm:$0xff]  ;;  %v270_v3 = vld [vmem:[%s728_s2 + $0x1a8] sm:$0xff]  ;;  %v299_v6 = vpack.c.bf16 %v254_v1, %v253_v0  ;;  %v235_v9 = vld [vmem:[%s728_s2 + $0x90] sm:$0xff]  ;;  %v282_v16 = vpack.c.bf16 %v220_v8, %v219_v7 }
  0x1d   : > { %344 = vmatpush.bf16.msra.mxu2 %v301_v46  ;;  %v307_v10 = vpack.c.bf16 %v270_v3, %v269_v2  ;;  %v236_v11 = vld [vmem:[%s728_s2 + $0x98] sm:$0xff]  ;;  %v251_v12 = vld [vmem:[%s728_s2 + $0x110] sm:$0xff]  ;;  %v217_v17 = vld [vmem:[%s728_s2] sm:$0xff] }
  0x1e   : > { %358 = vmatpush.bf16.msra.mxu3 %v309_v50  ;;  %v252_v13 = vld [vmem:[%s728_s2 + $0x118] sm:$0xff]  ;;  %v267_v14 = vld [vmem:[%s728_s2 + $0x190] sm:$0xff]  ;;  %v290_v18 = vpack.c.bf16 %v236_v11, %v235_v9  ;;  %v218_v20 = vld [vmem:[%s728_s2 + $0x8] sm:$0xff]  ;;  %v370_v50 = vstv %s369_s25 }
  0x1f   : > { %317 = vmatpush.bf16.msra.mxu0 %v284_v56  ;;  %v268_v15 = vld [vmem:[%s728_s2 + $0x198] sm:$0xff]  ;;  %v298_v19 = vpack.c.bf16 %v252_v13, %v251_v12  ;;  %v233_v21 = vld [vmem:[%s728_s2 + $0x80] sm:$0xff]  ;;  %v234_v23 = vld [vmem:[%s728_s2 + $0x88] sm:$0xff]  ;;  %v281_v28 = vpack.c.bf16 %v218_v20, %v217_v17 }
  0x20   : > { %331 = vmatpush.bf16.msra.mxu1 %v292_v57  ;;  %v306_v22 = vpack.c.bf16 %v268_v15, %v267_v14  ;;  %v249_v24 = vld [vmem:[%s728_s2 + $0x100] sm:$0xff]  ;;  %v250_v25 = vld [vmem:[%s728_s2 + $0x108] sm:$0xff]  ;;  %v289_v32 = vpack.c.bf16 %v234_v23, %v233_v21  ;;  %v207_v35 = vld [vmem:[%s197_s13 + $0x10] sm:$0xff] }
  0x21   : > { %345 = vmatpush.bf16.msra.mxu2 %v300_v58  ;;  %v265_v26 = vld [vmem:[%s728_s2 + $0x180] sm:$0xff]  ;;  %v266_v27 = vld [vmem:[%s728_s2 + $0x188] sm:$0xff]  ;;  %v297_v33 = vpack.c.bf16 %v250_v25, %v249_v24  ;;  %v211_v36 = vld [vmem:[%s197_s13 + $0x30] sm:$0xff] }
  0x22   : > { %359 = vmatpush.bf16.msra.mxu3 %v308_v62  ;;  %v205_v29 = vld [vmem:[%s197_s13] sm:$0xff]  ;;  %v206_v31 = vld [vmem:[%s197_s13 + $0x8] sm:$0xff]  ;;  %v305_v37 = vpack.c.bf16 %v266_v27, %v265_v26  ;;  %v208_v38 = vld [vmem:[%s197_s13 + $0x18] sm:$0xff]  ;;  %v215_v42 = vpack.c.bf16 %v211_v36, %v207_v35 }
  0x23   : > { %318 = vmatpush.bf16.msra.mxu0 %v283_v4  ;;  %v209_v30 = vld [vmem:[%s197_s13 + $0x20] sm:$0xff]  ;;  %v210_v34 = vld [vmem:[%s197_s13 + $0x28] sm:$0xff]  ;;  %v212_v39 = vld [vmem:[%s197_s13 + $0x38] sm:$0xff] }
  0x24   : > { %332 = vmatpush.bf16.msra.mxu1 %v291_v5  ;;  %v213_v40 = vpack.c.bf16 %v209_v30, %v205_v29  ;;  %v214_v41 = vpack.c.bf16 %v210_v34, %v206_v31  ;;  %v216_v43 = vpack.c.bf16 %v212_v39, %v208_v38  ;;  %v465_v52 = vld [vmem:[%s729_s3] ss:$0 sm:$0xff] }
  0x25   : > { %346 = vmatpush.bf16.msra.mxu2 %v299_v6 }
  0x26   : > { %360 = vmatpush.bf16.msra.mxu3 %v307_v10 }
  0x27   : > { %319 = vmatpush.bf16.msra.mxu0 %v282_v16 }
  0x28   : > { %333 = vmatpush.bf16.msra.mxu1 %v290_v18 }
  0x29   : > { %347 = vmatpush.bf16.msra.mxu2 %v298_v19 }
  0x2a   : > { %361 = vmatpush.bf16.msra.mxu3 %v306_v22 }
  0x2b   : > { %320 = vmatpush.bf16.msra.mxu0 %v281_v28 }
  0x2c   : > { %334 = vmatpush.bf16.msra.mxu1 %v289_v32 }
  0x2d   : > { %348 = vmatpush.bf16.msra.mxu2 %v297_v33 }
  0x2e   : > { %362 = vmatpush.bf16.msra.mxu3 %v305_v37  ;;  %321 = vmatmul.bf16.vlgmr.msra.gmra.mxu0 %v213_v40 }
  0x2f   : > { %335 = vmatmul.bf16.vlgmr.msra.gmra.mxu1 %v214_v41 }
  0x30   : > { %349 = vmatmul.bf16.vlgmr.msra.gmra.mxu2 %v215_v42 }
  0x31   : > { %363 = vmatmul.bf16.vlgmr.msra.gmra.mxu3 %v216_v43 }
  0xab   : > { %v322_v44 = vpop.f32.mrf.mxu0 }
  0xac   : > { %v336_v45 = vpop.f32.mrf.mxu1 }
  0xad   : > { %v337_v46 = vadd.f32 %v336_v45, %v322_v44 }
  0xb3   : > { %v350_v47 = vpop.f32.mrf.mxu2  ;;  %v324_v53 = vpop.f32.mrf.mxu0 }
  0xb4   : > { %v351_v48 = vadd.f32 %v350_v47, %v337_v46  ;;  %v364_v49 = vpop.f32.mrf.mxu3  ;;  %v338_v54 = vpop.f32.mrf.mxu1 }
  0xb5   : > { %v339_v57 = vadd.f32 %v338_v54, %v324_v53 }
  0xb6   : > { %v365_v51 = vadd.f32 %v364_v49, %v351_v48 }
  0xb8   : > { %v371_v55 = vmul.f32 %v370_v50, %v365_v51 }
  0xba   : > { %v377_v56 = vadd.f32 %v465_v52, %v371_v55 }
  0xbb   : > { %v352_v58 = vpop.f32.mrf.mxu2 }
  0xbc   : > { %vm379_vm0 = vcmp.ge.f32.partialorder %v377_v56, 0.0  ;;  %v381_v59 = vmul.f32 0.1, %v377_v56  ;;  %v353_v60 = vadd.f32 %v352_v58, %v339_v57  ;;  %v366_v61 = vpop.f32.mrf.mxu3 }
  0xbe   : > { %v383_v62 = vsel %vm379_vm0, %v377_v56, %v381_v59  ;;  %v367_v63 = vadd.f32 %v366_v61, %v353_v60 }
  0xbf   : > { %386 = vst.msk [vmem:[%s203_s5] sm:$0xff] %vm385_vm1, %v383_v62 }
  0xc0   : > { %v372_v0 = vmul.f32 %v370_v50, %v367_v63 }
  0xc2   : > { %v378_v1 = vadd.f32 %v465_v52, %v372_v0 }
  0xc4   : > { %vm380_vm2 = vcmp.ge.f32.partialorder %v378_v1, 0.0  ;;  %v382_v2 = vmul.f32 0.1, %v378_v1 }
  0xc6   : > { %v384_v3 = vsel %vm380_vm2, %v378_v1, %v382_v2 }
  0xc7   : > { %387 = vst.msk [vmem:[%s203_s5 + $0x8] sm:$0xff] %vm385_vm1, %v384_v3 }
  0xc8 PF: > { %s15_s17 = sadd.s32 1, %s472_s17  }
  0xc9   : > { %p12_p4 = scmp.ge.s32.totalorder %s15_s17, 4  }
  0xcb   :  { %14 = sbr.rel (!%p12_p4) target bundleno = 2 (0x2), region = 66 }

// kernel: discriminator_forward.9
= control target key start
LH: loop header
LB: loop body
LE: loop exit
PB: predicated region body
PF: predicated region fallthrough
CT: control target
= control target key end

     0   :  { %vm355_vm0 = vcmask 1024   ;;  %s786_s2 = inlined_call_operand.vmem [shape: f32[1024,1], index: 2, kind: input, shape index: {}]   ;;  %s787_s1 = inlined_call_operand.vmem [shape: f32[2,1024], index: 1, kind: input, shape index: {}]   ;;  %s788_s3 = inlined_call_operand.<no memory space> [shape: f32[1,1], index: 3, kind: input, shape index: {}]   ;;  %s789_s0 = inlined_call_operand.<no memory space> [shape: f32[1], index: 0, kind: input, shape index: {}]   ;;  %s790_s4 = inlined_call_operand.vmem [shape: f32[2,1], index: 4, kind: output, shape index: {}]  }
   0x1   :  { %v65_v0 = vld [vmem:[%s786_s2 + $0x70] sm:$0xff]  ;;  %v66_v1 = vld [vmem:[%s786_s2 + $0x78] sm:$0xff]  ;;  %v63_v11 = vld [vmem:[%s786_s2 + $0x60] sm:$0xff] }
   0x2   :  { %v81_v2 = vld [vmem:[%s786_s2 + $0xf0] sm:$0xff]  ;;  %v186_v3 = vpack.c.bf16 %v66_v1, %v65_v0  ;;  %v82_v4 = vld [vmem:[%s786_s2 + $0xf8] sm:$0xff]  ;;  %v64_v13 = vld [vmem:[%s786_s2 + $0x68] sm:$0xff] }
   0x3   :  { %v97_v5 = vld [vmem:[%s786_s2 + $0x170] sm:$0xff]  ;;  %v98_v6 = vld [vmem:[%s786_s2 + $0x178] sm:$0xff]  ;;  %v194_v7 = vpack.c.bf16 %v82_v4, %v81_v2  ;;  %v79_v14 = vld [vmem:[%s786_s2 + $0xe0] sm:$0xff]  ;;  %v185_v16 = vpack.c.bf16 %v64_v13, %v63_v11 }
   0x4   :  { %v202_v8 = vpack.c.bf16 %v98_v6, %v97_v5  ;;  %v113_v9 = vld [vmem:[%s786_s2 + $0x1f0] sm:$0xff]  ;;  %v114_v10 = vld [vmem:[%s786_s2 + $0x1f8] sm:$0xff]  ;;  %243 = vmatpush.bf16.msra.mxu0 %v186_v3  ;;  %v80_v15 = vld [vmem:[%s786_s2 + $0xe8] sm:$0xff] }
   0x5   :  { %v210_v12 = vpack.c.bf16 %v114_v10, %v113_v9  ;;  %256 = vmatpush.bf16.msra.mxu1 %v194_v7  ;;  %v193_v17 = vpack.c.bf16 %v80_v15, %v79_v14  ;;  %v95_v18 = vld [vmem:[%s786_s2 + $0x160] sm:$0xff]  ;;  %v96_v19 = vld [vmem:[%s786_s2 + $0x168] sm:$0xff]  ;;  %v61_v23 = vld [vmem:[%s786_s2 + $0x50] sm:$0xff] }
   0x6   :  { %269 = vmatpush.bf16.msra.mxu2 %v202_v8  ;;  %v111_v20 = vld [vmem:[%s786_s2 + $0x1e0] sm:$0xff]  ;;  %v201_v21 = vpack.c.bf16 %v96_v19, %v95_v18  ;;  %v112_v22 = vld [vmem:[%s786_s2 + $0x1e8] sm:$0xff]  ;;  %v62_v24 = vld [vmem:[%s786_s2 + $0x58] sm:$0xff] }
   0x7   :  { %282 = vmatpush.bf16.msra.mxu3 %v210_v12  ;;  %v209_v25 = vpack.c.bf16 %v112_v22, %v111_v20  ;;  %v77_v26 = vld [vmem:[%s786_s2 + $0xd0] sm:$0xff]  ;;  %v78_v27 = vld [vmem:[%s786_s2 + $0xd8] sm:$0xff]  ;;  %v184_v29 = vpack.c.bf16 %v62_v24, %v61_v23  ;;  %v59_v35 = vld [vmem:[%s786_s2 + $0x40] sm:$0xff] }
   0x8   :  { %v93_v28 = vld [vmem:[%s786_s2 + $0x150] sm:$0xff]  ;;  %244 = vmatpush.bf16.msra.mxu0 %v185_v16  ;;  %v94_v30 = vld [vmem:[%s786_s2 + $0x158] sm:$0xff]  ;;  %v192_v33 = vpack.c.bf16 %v78_v27, %v77_v26  ;;  %v60_v36 = vld [vmem:[%s786_s2 + $0x48] sm:$0xff] }
   0x9   :  { %v109_v31 = vld [vmem:[%s786_s2 + $0x1d0] sm:$0xff]  ;;  %v110_v32 = vld [vmem:[%s786_s2 + $0x1d8] sm:$0xff]  ;;  %257 = vmatpush.bf16.msra.mxu1 %v193_v17  ;;  %v200_v34 = vpack.c.bf16 %v94_v30, %v93_v28  ;;  %v75_v37 = vld [vmem:[%s786_s2 + $0xc0] sm:$0xff]  ;;  %v183_v44 = vpack.c.bf16 %v60_v36, %v59_v35 }
   0xa   :  { %270 = vmatpush.bf16.msra.mxu2 %v201_v21  ;;  %v208_v38 = vpack.c.bf16 %v110_v32, %v109_v31  ;;  %v76_v39 = vld [vmem:[%s786_s2 + $0xc8] sm:$0xff]  ;;  %v91_v40 = vld [vmem:[%s786_s2 + $0x140] sm:$0xff]  ;;  %v57_v47 = vld [vmem:[%s786_s2 + $0x30] sm:$0xff] }
   0xb   :  { %283 = vmatpush.bf16.msra.mxu3 %v209_v25  ;;  %v92_v41 = vld [vmem:[%s786_s2 + $0x148] sm:$0xff]  ;;  %v107_v42 = vld [vmem:[%s786_s2 + $0x1c0] sm:$0xff]  ;;  %v191_v45 = vpack.c.bf16 %v76_v39, %v75_v37  ;;  %v58_v48 = vld [vmem:[%s786_s2 + $0x38] sm:$0xff] }
   0xc   :  { %v108_v43 = vld [vmem:[%s786_s2 + $0x1c8] sm:$0xff]  ;;  %245 = vmatpush.bf16.msra.mxu0 %v184_v29  ;;  %v199_v46 = vpack.c.bf16 %v92_v41, %v91_v40  ;;  %v73_v49 = vld [vmem:[%s786_s2 + $0xb0] sm:$0xff]  ;;  %v74_v51 = vld [vmem:[%s786_s2 + $0xb8] sm:$0xff]  ;;  %v182_v56 = vpack.c.bf16 %v58_v48, %v57_v47 }
   0xd   :  { %258 = vmatpush.bf16.msra.mxu1 %v192_v33  ;;  %v207_v50 = vpack.c.bf16 %v108_v43, %v107_v42  ;;  %v89_v52 = vld [vmem:[%s786_s2 + $0x130] sm:$0xff]  ;;  %v90_v53 = vld [vmem:[%s786_s2 + $0x138] sm:$0xff]  ;;  %v190_v57 = vpack.c.bf16 %v74_v51, %v73_v49  ;;  %v55_v59 = vld [vmem:[%s786_s2 + $0x20] sm:$0xff] }
   0xe   :  { %271 = vmatpush.bf16.msra.mxu2 %v200_v34  ;;  %v105_v54 = vld [vmem:[%s786_s2 + $0x1b0] sm:$0xff]  ;;  %v106_v55 = vld [vmem:[%s786_s2 + $0x1b8] sm:$0xff]  ;;  %v198_v58 = vpack.c.bf16 %v90_v53, %v89_v52  ;;  %v56_v60 = vld [vmem:[%s786_s2 + $0x28] sm:$0xff] }
   0xf   :  { %284 = vmatpush.bf16.msra.mxu3 %v208_v38  ;;  %v71_v61 = vld [vmem:[%s786_s2 + $0xa0] sm:$0xff]  ;;  %v206_v62 = vpack.c.bf16 %v106_v55, %v105_v54  ;;  %v72_v63 = vld [vmem:[%s786_s2 + $0xa8] sm:$0xff]  ;;  %v181_v4 = vpack.c.bf16 %v56_v60, %v55_v59  ;;  %v53_v7 = vld [vmem:[%s786_s2 + $0x10] sm:$0xff] }
  0x10   :  { %246 = vmatpush.bf16.msra.mxu0 %v183_v44  ;;  %v87_v0 = vld [vmem:[%s786_s2 + $0x120] sm:$0xff]  ;;  %v88_v1 = vld [vmem:[%s786_s2 + $0x128] sm:$0xff]  ;;  %v189_v5 = vpack.c.bf16 %v72_v63, %v71_v61  ;;  %v54_v8 = vld [vmem:[%s786_s2 + $0x18] sm:$0xff] }
  0x11   :  { %259 = vmatpush.bf16.msra.mxu1 %v191_v45  ;;  %v103_v2 = vld [vmem:[%s786_s2 + $0x1a0] sm:$0xff]  ;;  %v104_v3 = vld [vmem:[%s786_s2 + $0x1a8] sm:$0xff]  ;;  %v197_v6 = vpack.c.bf16 %v88_v1, %v87_v0  ;;  %v69_v9 = vld [vmem:[%s786_s2 + $0x90] sm:$0xff]  ;;  %v180_v17 = vpack.c.bf16 %v54_v8, %v53_v7 }
  0x12   :  { %272 = vmatpush.bf16.msra.mxu2 %v199_v46  ;;  %v205_v10 = vpack.c.bf16 %v104_v3, %v103_v2  ;;  %v70_v11 = vld [vmem:[%s786_s2 + $0x98] sm:$0xff]  ;;  %v85_v12 = vld [vmem:[%s786_s2 + $0x110] sm:$0xff]  ;;  %v51_v16 = vld [vmem:[%s786_s2] sm:$0xff] }
  0x13   :  { %285 = vmatpush.bf16.msra.mxu3 %v207_v50  ;;  %v86_v13 = vld [vmem:[%s786_s2 + $0x118] sm:$0xff]  ;;  %v101_v14 = vld [vmem:[%s786_s2 + $0x190] sm:$0xff]  ;;  %v52_v18 = vld [vmem:[%s786_s2 + $0x8] sm:$0xff]  ;;  %v188_v21 = vpack.c.bf16 %v70_v11, %v69_v9 }
  0x14   :  { %247 = vmatpush.bf16.msra.mxu0 %v182_v56  ;;  %v102_v15 = vld [vmem:[%s786_s2 + $0x198] sm:$0xff]  ;;  %v67_v19 = vld [vmem:[%s786_s2 + $0x80] sm:$0xff]  ;;  %v68_v20 = vld [vmem:[%s786_s2 + $0x88] sm:$0xff]  ;;  %v196_v22 = vpack.c.bf16 %v86_v13, %v85_v12  ;;  %v179_v33 = vpack.c.bf16 %v52_v18, %v51_v16 }
  0x15   :  { %260 = vmatpush.bf16.msra.mxu1 %v190_v57  ;;  %v83_v23 = vld [vmem:[%s786_s2 + $0x100] sm:$0xff]  ;;  %v84_v24 = vld [vmem:[%s786_s2 + $0x108] sm:$0xff]  ;;  %v204_v26 = vpack.c.bf16 %v102_v15, %v101_v14  ;;  %v129_v28 = vld [vmem:[%s786_s2 + $0x270] sm:$0xff]  ;;  %v187_v37 = vpack.c.bf16 %v68_v20, %v67_v19 }
  0x16   :  { %273 = vmatpush.bf16.msra.mxu2 %v198_v58  ;;  %v99_v25 = vld [vmem:[%s786_s2 + $0x180] sm:$0xff]  ;;  %v100_v27 = vld [vmem:[%s786_s2 + $0x188] sm:$0xff]  ;;  %v130_v29 = vld [vmem:[%s786_s2 + $0x278] sm:$0xff]  ;;  %v195_v38 = vpack.c.bf16 %v84_v24, %v83_v23 }
  0x17   :  { %286 = vmatpush.bf16.msra.mxu3 %v206_v62  ;;  %v145_v30 = vld [vmem:[%s786_s2 + $0x2f0] sm:$0xff]  ;;  %v146_v31 = vld [vmem:[%s786_s2 + $0x2f8] sm:$0xff]  ;;  %v20_v32 = vld [vmem:[%s787_s1] sm:$0xff]  ;;  %v203_v41 = vpack.c.bf16 %v100_v27, %v99_v25  ;;  %v218_v42 = vpack.c.bf16 %v130_v29, %v129_v28 }
  0x18   :  { %248 = vmatpush.bf16.msra.mxu0 %v181_v4  ;;  %v161_v34 = vld [vmem:[%s786_s2 + $0x370] sm:$0xff]  ;;  %v162_v35 = vld [vmem:[%s786_s2 + $0x378] sm:$0xff]  ;;  %v21_v36 = vld [vmem:[%s787_s1 + $0x8] sm:$0xff]  ;;  %24 = vst [vmem:[#allocation1] ss:$4 sm:$0xff] %v20_v32  ;;  %v226_v44 = vpack.c.bf16 %v146_v31, %v145_v30 }
  0x19   :  { %261 = vmatpush.bf16.msra.mxu1 %v189_v5  ;;  %v177_v39 = vld [vmem:[%s786_s2 + $0x3f0] sm:$0xff]  ;;  %v178_v40 = vld [vmem:[%s786_s2 + $0x3f8] sm:$0xff]  ;;  %26 = vst [vmem:[#allocation1 + $0x20] ss:$4 sm:$0xff] %v21_v36  ;;  %v127_v43 = vld [vmem:[%s786_s2 + $0x260] sm:$0xff]  ;;  %v234_v45 = vpack.c.bf16 %v162_v35, %v161_v34 }
  0x1a   :  { %274 = vmatpush.bf16.msra.mxu2 %v197_v6  ;;  %v128_v46 = vld [vmem:[%s786_s2 + $0x268] sm:$0xff]  ;;  %v143_v47 = vld [vmem:[%s786_s2 + $0x2e0] sm:$0xff]  ;;  %v242_v49 = vpack.c.bf16 %v178_v40, %v177_v39  ;;  %v125_v54 = vld [vmem:[%s786_s2 + $0x250] sm:$0xff] }
  0x1b   :  { %287 = vmatpush.bf16.msra.mxu3 %v205_v10  ;;  %v144_v48 = vld [vmem:[%s786_s2 + $0x2e8] sm:$0xff]  ;;  %v159_v50 = vld [vmem:[%s786_s2 + $0x360] sm:$0xff]  ;;  %v126_v55 = vld [vmem:[%s786_s2 + $0x258] sm:$0xff]  ;;  %v217_v56 = vpack.c.bf16 %v128_v46, %v127_v43 }
  0x1c   :  { %249 = vmatpush.bf16.msra.mxu0 %v180_v17  ;;  %v160_v51 = vld [vmem:[%s786_s2 + $0x368] sm:$0xff]  ;;  %v175_v52 = vld [vmem:[%s786_s2 + $0x3e0] sm:$0xff]  ;;  %v141_v57 = vld [vmem:[%s786_s2 + $0x2d0] sm:$0xff]  ;;  %v225_v61 = vpack.c.bf16 %v144_v48, %v143_v47  ;;  %v216_v10 = vpack.c.bf16 %v126_v55, %v125_v54 }
  0x1d   :  { %262 = vmatpush.bf16.msra.mxu1 %v188_v21  ;;  %v176_v53 = vld [vmem:[%s786_s2 + $0x3e8] sm:$0xff]  ;;  %v142_v58 = vld [vmem:[%s786_s2 + $0x2d8] sm:$0xff]  ;;  %v157_v59 = vld [vmem:[%s786_s2 + $0x350] sm:$0xff]  ;;  %v233_v62 = vpack.c.bf16 %v160_v51, %v159_v50 }
  0x1e   :  { %275 = vmatpush.bf16.msra.mxu2 %v196_v22  ;;  %v158_v60 = vld [vmem:[%s786_s2 + $0x358] sm:$0xff]  ;;  %v241_v1 = vpack.c.bf16 %v176_v53, %v175_v52  ;;  %v173_v6 = vld [vmem:[%s786_s2 + $0x3d0] sm:$0xff]  ;;  %v224_v11 = vpack.c.bf16 %v142_v58, %v141_v57  ;;  %v123_v13 = vld [vmem:[%s786_s2 + $0x240] sm:$0xff] }
  0x1f   :  { %288 = vmatpush.bf16.msra.mxu3 %v204_v26  ;;  %v29_v63 = vld.sshfl [vmem:[#allocation1 + $0x10] sm:$0xff pattern:$0x73625140]  ;;  %v30_v0 = vld.sshfl [vmem:[#allocation1 + $0x18] sm:$0xff pattern:$0x73625140]  ;;  %v232_v12 = vpack.c.bf16 %v158_v60, %v157_v59 }
  0x20   :  { %250 = vmatpush.bf16.msra.mxu0 %v179_v33  ;;  %v45_v2 = vpack.c.bf16 %v29_v63, %v29_v63  ;;  %v27_v3 = vld.sshfl [vmem:[#allocation1] sm:$0xff pattern:$0x73625140]  ;;  %v28_v4 = vld.sshfl [vmem:[#allocation1 + $0x8] sm:$0xff pattern:$0x73625140]  ;;  %v46_v5 = vpack.c.bf16 %v30_v0, %v30_v0 }
  0x21   :  { %263 = vmatpush.bf16.msra.mxu1 %v187_v37  ;;  %v174_v7 = vld [vmem:[%s786_s2 + $0x3d8] sm:$0xff]  ;;  %v43_v8 = vpack.c.bf16 %v27_v3, %v27_v3  ;;  %v44_v9 = vpack.c.bf16 %v28_v4, %v28_v4  ;;  %v124_v14 = vld [vmem:[%s786_s2 + $0x248] sm:$0xff]  ;;  %v139_v15 = vld [vmem:[%s786_s2 + $0x2c0] sm:$0xff] }
  0x22   :  { %276 = vmatpush.bf16.msra.mxu2 %v195_v38  ;;  %v240_v16 = vpack.c.bf16 %v174_v7, %v173_v6  ;;  %v140_v17 = vld [vmem:[%s786_s2 + $0x2c8] sm:$0xff]  ;;  %v155_v18 = vld [vmem:[%s786_s2 + $0x340] sm:$0xff]  ;;  %v215_v22 = vpack.c.bf16 %v124_v14, %v123_v13  ;;  %v121_v25 = vld [vmem:[%s786_s2 + $0x230] sm:$0xff] }
  0x23   :  { %289 = vmatpush.bf16.msra.mxu3 %v203_v41  ;;  %251 = vmatmul.bf16.vlgmr.msra.gmra.mxu0 %v43_v8  ;;  %v156_v19 = vld [vmem:[%s786_s2 + $0x348] sm:$0xff]  ;;  %v171_v20 = vld [vmem:[%s786_s2 + $0x3c0] sm:$0xff]  ;;  %v223_v23 = vpack.c.bf16 %v140_v17, %v139_v15  ;;  %v122_v26 = vld [vmem:[%s786_s2 + $0x238] sm:$0xff] }
  0x24   :  { %295 = vmatpush.bf16.msrb.mxu0 %v218_v42  ;;  %264 = vmatmul.bf16.vlgmr.msra.gmra.mxu1 %v44_v9  ;;  %v172_v21 = vld [vmem:[%s786_s2 + $0x3c8] sm:$0xff]  ;;  %v231_v24 = vpack.c.bf16 %v156_v19, %v155_v18  ;;  %v137_v27 = vld [vmem:[%s786_s2 + $0x2b0] sm:$0xff]  ;;  %v138_v29 = vld [vmem:[%s786_s2 + $0x2b8] sm:$0xff]  ;;  %v214_v34 = vpack.c.bf16 %v122_v26, %v121_v25  ;;  %v10_v18 = vstv %s788_s3 }
  0x25   :  { %308 = vmatpush.bf16.msrb.mxu1 %v226_v44  ;;  %277 = vmatmul.bf16.vlgmr.msra.gmra.mxu2 %v45_v2  ;;  %v239_v28 = vpack.c.bf16 %v172_v21, %v171_v20  ;;  %v153_v30 = vld [vmem:[%s786_s2 + $0x330] sm:$0xff]  ;;  %v154_v31 = vld [vmem:[%s786_s2 + $0x338] sm:$0xff]  ;;  %v222_v35 = vpack.c.bf16 %v138_v29, %v137_v27  ;;  %v119_v37 = vld [vmem:[%s786_s2 + $0x220] sm:$0xff]  ;;  %11 = vst [vmem:[#allocation3] sm:$0x1] %v10_v18 }
  0x26   :  { %321 = vmatpush.bf16.msrb.mxu2 %v234_v45  ;;  %290 = vmatmul.bf16.vlgmr.msra.gmra.mxu3 %v46_v5  ;;  %v169_v32 = vld [vmem:[%s786_s2 + $0x3b0] sm:$0xff]  ;;  %v170_v33 = vld [vmem:[%s786_s2 + $0x3b8] sm:$0xff]  ;;  %v230_v36 = vpack.c.bf16 %v154_v31, %v153_v30  ;;  %v120_v38 = vld [vmem:[%s786_s2 + $0x228] sm:$0xff] }
  0x27   :  { %334 = vmatpush.bf16.msrb.mxu3 %v242_v49  ;;  %v135_v39 = vld [vmem:[%s786_s2 + $0x2a0] sm:$0xff]  ;;  %v238_v40 = vpack.c.bf16 %v170_v33, %v169_v32  ;;  %v136_v41 = vld [vmem:[%s786_s2 + $0x2a8] sm:$0xff]  ;;  %v213_v46 = vpack.c.bf16 %v120_v38, %v119_v37  ;;  %v117_v49 = vld [vmem:[%s786_s2 + $0x210] sm:$0xff]  ;;  %v348_v38 = vstv %s789_s0 }
  0x28   :  { %296 = vmatpush.bf16.msrb.mxu0 %v217_v56  ;;  %v151_v42 = vld [vmem:[%s786_s2 + $0x320] sm:$0xff]  ;;  %v152_v43 = vld [vmem:[%s786_s2 + $0x328] sm:$0xff]  ;;  %v221_v47 = vpack.c.bf16 %v136_v41, %v135_v39  ;;  %v118_v50 = vld [vmem:[%s786_s2 + $0x218] sm:$0xff] }
  0x29   :  { %309 = vmatpush.bf16.msrb.mxu1 %v225_v61  ;;  %v167_v44 = vld [vmem:[%s786_s2 + $0x3a0] sm:$0xff]  ;;  %v168_v45 = vld [vmem:[%s786_s2 + $0x3a8] sm:$0xff]  ;;  %v229_v48 = vpack.c.bf16 %v152_v43, %v151_v42  ;;  %v133_v51 = vld [vmem:[%s786_s2 + $0x290] sm:$0xff]  ;;  %v212_v58 = vpack.c.bf16 %v118_v50, %v117_v49 }
  0x2a   :  { %322 = vmatpush.bf16.msrb.mxu2 %v233_v62  ;;  %v237_v52 = vpack.c.bf16 %v168_v45, %v167_v44  ;;  %v134_v53 = vld [vmem:[%s786_s2 + $0x298] sm:$0xff]  ;;  %v149_v54 = vld [vmem:[%s786_s2 + $0x310] sm:$0xff]  ;;  %v115_v61 = vld [vmem:[%s786_s2 + $0x200] sm:$0xff] }
  0x2b   :  { %335 = vmatpush.bf16.msrb.mxu3 %v241_v1  ;;  %v150_v55 = vld [vmem:[%s786_s2 + $0x318] sm:$0xff]  ;;  %v165_v56 = vld [vmem:[%s786_s2 + $0x390] sm:$0xff]  ;;  %v220_v59 = vpack.c.bf16 %v134_v53, %v133_v51  ;;  %v116_v62 = vld [vmem:[%s786_s2 + $0x208] sm:$0xff] }
  0x2c   :  { %297 = vmatpush.bf16.msrb.mxu0 %v216_v10  ;;  %v166_v57 = vld [vmem:[%s786_s2 + $0x398] sm:$0xff]  ;;  %v228_v60 = vpack.c.bf16 %v150_v55, %v149_v54  ;;  %v131_v63 = vld [vmem:[%s786_s2 + $0x280] sm:$0xff]  ;;  %v132_v1 = vld [vmem:[%s786_s2 + $0x288] sm:$0xff]  ;;  %v211_v6 = vpack.c.bf16 %v116_v62, %v115_v61 }
  0x2d   :  { %310 = vmatpush.bf16.msrb.mxu1 %v224_v11  ;;  %v236_v0 = vpack.c.bf16 %v166_v57, %v165_v56  ;;  %v147_v2 = vld [vmem:[%s786_s2 + $0x300] sm:$0xff]  ;;  %v148_v3 = vld [vmem:[%s786_s2 + $0x308] sm:$0xff]  ;;  %v219_v8 = vpack.c.bf16 %v132_v1, %v131_v63  ;;  %v33_v11 = vld.sshfl [vmem:[#allocation1 + $0x30] sm:$0xff pattern:$0x73625140] }
  0x2e   :  { %323 = vmatpush.bf16.msrb.mxu2 %v232_v12  ;;  %v163_v4 = vld [vmem:[%s786_s2 + $0x380] sm:$0xff]  ;;  %v164_v5 = vld [vmem:[%s786_s2 + $0x388] sm:$0xff]  ;;  %v227_v9 = vpack.c.bf16 %v148_v3, %v147_v2  ;;  %v34_v13 = vld.sshfl [vmem:[#allocation1 + $0x38] sm:$0xff pattern:$0x73625140] }
  0x2f   :  { %336 = vmatpush.bf16.msrb.mxu3 %v240_v16  ;;  %v31_v7 = vld.sshfl [vmem:[#allocation1 + $0x20] sm:$0xff pattern:$0x73625140]  ;;  %v32_v10 = vld.sshfl [vmem:[#allocation1 + $0x28] sm:$0xff pattern:$0x73625140]  ;;  %v235_v12 = vpack.c.bf16 %v164_v5, %v163_v4  ;;  %v49_v16 = vpack.c.bf16 %v33_v11, %v33_v11  ;;  %v50_v17 = vpack.c.bf16 %v34_v13, %v34_v13 }
  0x30   :  { %298 = vmatpush.bf16.msrb.mxu0 %v215_v22  ;;  %v47_v14 = vpack.c.bf16 %v31_v7, %v31_v7  ;;  %v48_v15 = vpack.c.bf16 %v32_v10, %v32_v10  ;;  %v361_v41 = vld [vmem:[#allocation3] ss:$0 sm:$0xff] }
  0x31   :  { %311 = vmatpush.bf16.msrb.mxu1 %v223_v23 }
  0x32   :  { %324 = vmatpush.bf16.msrb.mxu2 %v231_v24 }
  0x33   :  { %337 = vmatpush.bf16.msrb.mxu3 %v239_v28 }
  0x34   :  { %299 = vmatpush.bf16.msrb.mxu0 %v214_v34 }
  0x35   :  { %312 = vmatpush.bf16.msrb.mxu1 %v222_v35 }
  0x36   :  { %325 = vmatpush.bf16.msrb.mxu2 %v230_v36 }
  0x37   :  { %338 = vmatpush.bf16.msrb.mxu3 %v238_v40 }
  0x38   :  { %300 = vmatpush.bf16.msrb.mxu0 %v213_v46 }
  0x39   :  { %313 = vmatpush.bf16.msrb.mxu1 %v221_v47 }
  0x3a   :  { %326 = vmatpush.bf16.msrb.mxu2 %v229_v48 }
  0x3b   :  { %339 = vmatpush.bf16.msrb.mxu3 %v237_v52 }
  0x3c   :  { %301 = vmatpush.bf16.msrb.mxu0 %v212_v58 }
  0x3d   :  { %314 = vmatpush.bf16.msrb.mxu1 %v220_v59 }
  0x3e   :  { %327 = vmatpush.bf16.msrb.mxu2 %v228_v60 }
  0x3f   :  { %340 = vmatpush.bf16.msrb.mxu3 %v236_v0 }
  0x40   :  { %302 = vmatpush.bf16.msrb.mxu0 %v211_v6 }
  0x41   :  { %315 = vmatpush.bf16.msrb.mxu1 %v219_v8 }
  0x42   :  { %328 = vmatpush.bf16.msrb.mxu2 %v227_v9 }
  0x43   :  { %341 = vmatpush.bf16.msrb.mxu3 %v235_v12  ;;  %303 = vmatmul.bf16.vlgmr.msrb.gmra.mxu0 %v47_v14 }
  0x44   :  { %316 = vmatmul.bf16.vlgmr.msrb.gmra.mxu1 %v48_v15 }
  0x45   :  { %329 = vmatmul.bf16.vlgmr.msrb.gmra.mxu2 %v49_v16 }
  0x46   :  { %342 = vmatmul.bf16.vlgmr.msrb.gmra.mxu3 %v50_v17 }
  0xa0   :  { %v252_v19 = vpop.f32.mrf.mxu0 }
  0xa1   :  { %v265_v20 = vpop.f32.mrf.mxu1 }
  0xa2   :  { %v266_v27 = vadd.f32 %v265_v20, %v252_v19 }
  0xa8   :  { %v278_v21 = vpop.f32.mrf.mxu2  ;;  %v254_v23 = vpop.f32.mrf.mxu0 }
  0xa9   :  { %v291_v22 = vpop.f32.mrf.mxu3  ;;  %v267_v24 = vpop.f32.mrf.mxu1  ;;  %v279_v28 = vadd.f32 %v278_v21, %v266_v27 }
  0xab   :  { %v292_v29 = vadd.f32 %v291_v22, %v279_v28 }
  0xb0   :  { %v280_v25 = vpop.f32.mrf.mxu2 }
  0xb1   :  { %v293_v26 = vpop.f32.mrf.mxu3 }
  0xc0   :  { %v304_v30 = vpop.f32.mrf.mxu0 }
  0xc1   :  { %v317_v31 = vpop.f32.mrf.mxu1  ;;  %v305_v32 = vadd.f32 %v304_v30, %v292_v29 }
  0xc3   :  { %v318_v33 = vadd.f32 %v317_v31, %v305_v32 }
  0xc8   :  { %v330_v34 = vpop.f32.mrf.mxu2  ;;  %v306_v37 = vpop.f32.mrf.mxu0 }
  0xc9   :  { %v331_v35 = vadd.f32 %v330_v34, %v318_v33  ;;  %v343_v36 = vpop.f32.mrf.mxu3  ;;  %v319_v39 = vpop.f32.mrf.mxu1 }
  0xcb   :  { %v344_v40 = vadd.f32 %v343_v36, %v331_v35 }
  0xcd   :  { %v349_v42 = vmul.f32 %v348_v38, %v344_v40 }
  0xcf   :  { %v354_v43 = vadd.f32 %v361_v41, %v349_v42 }
  0xd0   :  { %v332_v44 = vpop.f32.mrf.mxu2 }
  0xd1   :  { %356 = vst.msk [vmem:[%s790_s4] sm:$0x3] %vm355_vm0, %v354_v43  ;;  %v345_v45 = vpop.f32.mrf.mxu3 }

</bundles_post_ra>
